<compile_context>
chip_gen: v5e
topology: v5e:2x2
jax: 0.10.0
libtpu: 0.0.40
codegen_flags: <defaults>
</compile_context>

<pallas_src>
import numpy as np
import jax
import jax.numpy as jnp
from jax import lax
from jax.experimental import pallas as pl
from jax.experimental.pallas import tpu as pltpu


# ----------------------------------------------------------------------------
# Fused kernel: NonLocalBlock + concat + SELayer (per batch element, channel-major)
# ----------------------------------------------------------------------------
def asm_kernel(x_ref, xp_ref, bam_ref, ccm_ref,
               thw_ref, thb_ref, pgw_ref, pgb_ref,
               wzw_ref, wzb_ref, fcs_ref, o_ref):
    f32, bf16 = jnp.float32, jnp.bfloat16
    C = x_ref.shape[1]
    HW = x_ref.shape[2]
    I = thw_ref.shape[0]
    Cb = bam_ref.shape[1]
    Cc = ccm_ref.shape[1]
    A = Cb + C + Cc

    x = x_ref[0]                                    # (C, HW)  f32, channel-major
    x_bf = x.astype(bf16)

    # theta 1x1 conv, channel-major: (I, HW)
    theta = jnp.dot(thw_ref[...], x_bf, preferred_element_type=f32) + thb_ref[...]

    # [phi | g] 1x1 conv on the 4 pooling quadrants (stacked along sublanes), then the
    # 2x2 max-pool as an elementwise max of the 4 conv outputs (exact for 1x1 conv).
    xq = xp_ref[0]                                  # (4C, HW4) bf16
    pgw = pgw_ref[...]                              # (2I, C)   bf16
    pg_p = jnp.dot(pgw, xq[0:C], preferred_element_type=f32)
    for q in range(1, 4):
        pg_p = jnp.maximum(
            pg_p, jnp.dot(pgw, xq[q * C:(q + 1) * C], preferred_element_type=f32))
    pg_p = pg_p + pgb_ref[...]                      # (2I, HW4) f32
    phi_p = pg_p[0:I]                               # (I, HW4)  sublane slice (free)
    g_p = pg_p[I:2 * I]                             # (I, HW4)

    # Attention logits, transposed & lane-dense: f_T[k, q] = phi_p[:, k] . theta[:, q]
    f_t = lax.dot_general(phi_p, theta, (((0,), (0,)), ((), ())),
                          preferred_element_type=f32)          # (HW4, HW) f32

    # softmax over keys (axis 0); approx reciprocal is a uniform per-query scale (EUP slot)
    m = jnp.max(f_t, axis=0, keepdims=True)
    e = jnp.exp(f_t - m)
    s = jnp.sum(e, axis=0, keepdims=True)
    p_t = e * pl.reciprocal(s, approx=True)                    # (HW4, HW)

    # value matmul -> y already channel-major: (I, HW)
    y = jnp.dot(g_p.astype(bf16), p_t.astype(bf16), preferred_element_type=f32)

    # W 1x1 conv (bias + eval-mode BN folded) + residual, channel-major
    w_y = jnp.dot(wzw_ref[...], y.astype(bf16), preferred_element_type=f32) + wzb_ref[...]
    z = w_y + x                                                 # (C, HW) f32

    # ---- SELayer without materializing cat ----
    bam = bam_ref[0]                                            # (Cb, HW)
    ccm = ccm_ref[0]                                            # (Cc, HW)
    inv_hw = 1.0 / HW
    pooled = jnp.concatenate(
        [jnp.sum(bam, axis=1, keepdims=True),
         jnp.sum(z, axis=1, keepdims=True),
         jnp.sum(ccm, axis=1, keepdims=True)], axis=0) * inv_hw  # (A, 1)

    fcs = fcs_ref[...]                                          # (2A, Ar)
    fc1 = fcs[0:A]                                              # (A, Ar)
    fc2 = fcs[A:2 * A]                                          # (A, Ar)
    h = jnp.maximum(jnp.sum(fc1 * pooled, axis=0, keepdims=True), 0.0)   # (1, Ar)
    zz = jnp.sum(fc2 * h, axis=1, keepdims=True)                         # (A, 1)
    gate = 1.0 / (1.0 + jnp.exp(-zz))   # exact divide: gate scales the whole output

    # gated slabs written directly into sublane sub-ranges of the (A, HW) output block
    o_ref[0, 0:Cb, :] = (bam * gate[0:Cb]).astype(o_ref.dtype)
    o_ref[0, Cb:Cb + C, :] = (z * gate[Cb:Cb + C]).astype(o_ref.dtype)
    o_ref[0, Cb + C:A, :] = (ccm * gate[Cb + C:A]).astype(o_ref.dtype)


# ----------------------------------------------------------------------------
# Wrapper: layout glue + parameter fusion + pallas_call
# ----------------------------------------------------------------------------
def asm_pallas(bam, fuse, ccm, p):
    B, C, H, W = fuse.shape
    assert H % 2 == 0 and W % 2 == 0, "NonLocal sub_sample (MaxPool2d(2)) needs even H, W"
    Cb, Cc = bam.shape[1], ccm.shape[1]
    A = Cb + C + Cc
    HW, HW4 = H * W, (H * W) // 4
    I = p['theta_w'].shape[1]
    Ar = p['fc1_w_t'].shape[1]
    f32, bf16 = jnp.float32, jnp.bfloat16

    # --- layout glue: pure reshapes for x/bam/ccm; one transpose builds the quadrant slab ---
    x_cm = fuse.reshape(B, C, HW)                               # (B, C, HW) f32
    x_perm = (fuse.reshape(B, C, H // 2, 2, W // 2, 2)
                  .transpose(0, 3, 5, 1, 2, 4)
                  .reshape(B, 4 * C, HW4)).astype(bf16)         # quadrant-stacked, bf16
    bam_cm = bam.reshape(B, Cb, HW)
    ccm_cm = ccm.reshape(B, Cc, HW)

    # --- parameter fusion (tiny, one-time XLA glue), all pre-transposed for channel-major ---
    thw = p['theta_w'].T.astype(bf16)                            # (I, C)
    thb = p['theta_b'].reshape(I, 1)
    pgw = jnp.concatenate([p['phi_w'].T, p['g_w'].T], axis=0).astype(bf16)   # (2I, C)
    pgb = jnp.concatenate([p['phi_b'], p['g_b']]).reshape(2 * I, 1)
    wzw = (p['W_w'] * p['bn_scale'][None, :]).T.astype(bf16)     # (C, I)  BN folded into W
    wzb = (p['W_b'] * p['bn_scale'] + p['bn_shift']).reshape(C, 1)
    fcs = jnp.concatenate([p['fc1_w_t'], p['fc2_w_t'].T], axis=0).astype(f32)  # (2A, Ar)

    out_cm = pl.pallas_call(
        asm_kernel,
        out_shape=jax.ShapeDtypeStruct((B, A, HW), f32),
        grid=(B,),
        in_specs=[
            pl.BlockSpec((1, C, HW), lambda b: (b, 0, 0)),       # x channel-major (f32)
            pl.BlockSpec((1, 4 * C, HW4), lambda b: (b, 0, 0)),  # pooling quadrants (bf16)
            pl.BlockSpec((1, Cb, HW), lambda b: (b, 0, 0)),      # bam channel-major
            pl.BlockSpec((1, Cc, HW), lambda b: (b, 0, 0)),      # ccm channel-major
            pl.BlockSpec((I, C), lambda b: (0, 0)),              # theta_w^T
            pl.BlockSpec((I, 1), lambda b: (0, 0)),
            pl.BlockSpec((2 * I, C), lambda b: (0, 0)),          # [phi | g]^T
            pl.BlockSpec((2 * I, 1), lambda b: (0, 0)),
            pl.BlockSpec((C, I), lambda b: (0, 0)),              # (W * bn_scale)^T
            pl.BlockSpec((C, 1), lambda b: (0, 0)),              # W_b*bn_scale + bn_shift
            pl.BlockSpec((2 * A, Ar), lambda b: (0, 0)),         # [fc1 ; fc2^T] packed
        ],
        out_specs=pl.BlockSpec((1, A, HW), lambda b: (b, 0, 0)),
        compiler_params=pltpu.CompilerParams(dimension_semantics=("parallel",)),
    )(x_cm, x_perm, bam_cm, ccm_cm, thw, thb, pgw, pgb, wzw, wzb, fcs)

    # lane-dense (B, A, HW) -> NCHW is a pure reshape (no transpose).
    return out_cm.reshape(B, A, H, W)


# ----------------------------------------------------------------------------
# Pure-JAX reference (mirrors the PyTorch forward semantics) for validation
# ----------------------------------------------------------------------------
def asm_reference(bam, fuse, ccm, p):
    B, C, H, W = fuse.shape
    I = p['theta_w'].shape[1]

    def conv1x1(x, w, b):  # x: NCHW, w: (Cin, Cout)
        y = jnp.einsum('bchw,cd->bdhw', x, w)
        return y + b[None, :, None, None]

    def maxpool2(x):       # NCHW, kernel 2x2 stride 2
        b, c, h, w = x.shape
        return jnp.max(x.reshape(b, c, h // 2, 2, w // 2, 2), axis=(3, 5))

    g_x = maxpool2(conv1x1(fuse, p['g_w'], p['g_b'])).reshape(B, I, -1).transpose(0, 2, 1)
    theta_x = conv1x1(fuse, p['theta_w'], p['theta_b']).reshape(B, I, -1).transpose(0, 2, 1)
    phi_x = maxpool2(conv1x1(fuse, p['phi_w'], p['phi_b'])).reshape(B, I, -1)
    f = theta_x @ phi_x
    f_div_c = jax.nn.softmax(f, axis=-1)
    y = (f_div_c @ g_x).transpose(0, 2, 1).reshape(B, I, H, W)
    w_y = conv1x1(y, p['W_w'], p['W_b'])
    w_y = w_y * p['bn_scale'][None, :, None, None] + p['bn_shift'][None, :, None, None]
    z = w_y + fuse

    cat = jnp.concatenate([bam, z, ccm], axis=1)
    pooled = cat.mean(axis=(2, 3))
    h = jnp.maximum(pooled @ p['fc1_w_t'], 0.0)
    gate = jax.nn.sigmoid(h @ p['fc2_w_t'])
    return cat * gate[:, :, None, None]


# ----------------------------------------------------------------------------
if __name__ == "__main__":
    key = jax.random.PRNGKey(0)
    B, C, H, W = 2, 16, 16, 16          # fuse: in_channels = 16 -> inter = 8
    Cb = Cc = 16
    A = Cb + C + Cc                     # all_channels = 48
    I = C // 2                          # inter_channels = 8
    reduction = 16
    Ar = A // reduction                 # 3

    ks = jax.random.split(key, 16)

    def init(k, shape, scale=0.1):
        return (scale * jax.random.normal(k, shape)).astype(jnp.float32)

    params = dict(
        theta_w=init(ks[0], (C, I)), theta_b=init(ks[1], (I,)),
        phi_w=init(ks[2], (C, I)),   phi_b=init(ks[3], (I,)),
        g_w=init(ks[4], (C, I)),     g_b=init(ks[5], (I,)),
        W_w=init(ks[6], (I, C)),     W_b=init(ks[7], (C,)),
        bn_gamma=init(ks[8], (C,)),  bn_beta=init(ks[9], (C,)),
        fc1_w_t=init(ks[10], (A, Ar)),   # Linear(A, A//r, bias=False), pre-transposed
        fc2_w_t=init(ks[11], (Ar, A)),   # Linear(A//r, A, bias=False), pre-transposed
    )
    # BatchNorm2d folded into an affine (inference-mode, running_mean=0, running_var=1).
    # TODO(synk): training-mode BatchNorm2d (batch statistics across B,H,W) not implemented.
    eps = 1e-5
    run_mean = jnp.zeros((C,), jnp.float32)
    run_var = jnp.ones((C,), jnp.float32)
    params['bn_scale'] = params['bn_gamma'] / jnp.sqrt(run_var + eps)
    params['bn_shift'] = params['bn_beta'] - run_mean * params['bn_scale']

    bam = jax.random.normal(ks[12], (B, Cb, H, W), jnp.float32)
    fuse = jax.random.normal(ks[13], (B, C, H, W), jnp.float32)
    ccm = jax.random.normal(ks[14], (B, Cc, H, W), jnp.float32)

    out = jax.block_until_ready(asm_pallas(bam, fuse, ccm, params))
    ref = jax.block_until_ready(asm_reference(bam, fuse, ccm, params))

    assert out.shape == (B, A, H, W), out.shape
    # bf16 MXU operands + approx softmax reciprocal: errors stay well inside 2e-3 because
    # the logits/softmax, residual path and SE gate remain in f32.
    np.testing.assert_allclose(np.asarray(out), np.asarray(ref), rtol=2e-3, atol=2e-3)
    print("KERNEL_OK")
</pallas_src>

<mosaic_0001>
module attributes {stable_mosaic.version = 11 : i64} {
  func.func @asm_kernel(%arg0: i32, %arg1: memref<1x16x256xf32, #tpu.memory_space<vmem>>, %arg2: memref<1x64x64xbf16, #tpu.memory_space<vmem>>, %arg3: memref<1x16x256xf32, #tpu.memory_space<vmem>>, %arg4: memref<1x16x256xf32, #tpu.memory_space<vmem>>, %arg5: memref<8x16xbf16, #tpu.memory_space<vmem>>, %arg6: memref<8x1xf32, #tpu.memory_space<vmem>>, %arg7: memref<16x16xbf16, #tpu.memory_space<vmem>>, %arg8: memref<16x1xf32, #tpu.memory_space<vmem>>, %arg9: memref<16x8xbf16, #tpu.memory_space<vmem>>, %arg10: memref<16x1xf32, #tpu.memory_space<vmem>>, %arg11: memref<96x3xf32, #tpu.memory_space<vmem>>, %arg12: memref<1x48x256xf32, #tpu.memory_space<vmem>>) attributes {dimension_semantics = [#tpu.dimension_semantics<parallel>], iteration_bounds = array<i64: 2>, scalar_prefetch = 0 : i64, scratch_operands = 0 : i64, tpu.core_type = #tpu.core_type<tc>, window_params = [{transform_indices = @transform_0, window_bounds = array<i64: 1, 16, 256>}, {transform_indices = @transform_1, window_bounds = array<i64: 1, 64, 64>}, {transform_indices = @transform_2, window_bounds = array<i64: 1, 16, 256>}, {transform_indices = @transform_3, window_bounds = array<i64: 1, 16, 256>}, {pipeline_mode = #tpu.pipeline_mode<synchronous>, transform_indices = @transform_4, window_bounds = array<i64: 8, 16>}, {pipeline_mode = #tpu.pipeline_mode<synchronous>, transform_indices = @transform_5, window_bounds = array<i64: 8, 1>}, {pipeline_mode = #tpu.pipeline_mode<synchronous>, transform_indices = @transform_6, window_bounds = array<i64: 16, 16>}, {pipeline_mode = #tpu.pipeline_mode<synchronous>, transform_indices = @transform_7, window_bounds = array<i64: 16, 1>}, {pipeline_mode = #tpu.pipeline_mode<synchronous>, transform_indices = @transform_8, window_bounds = array<i64: 16, 8>}, {pipeline_mode = #tpu.pipeline_mode<synchronous>, transform_indices = @transform_9, window_bounds = array<i64: 16, 1>}, {pipeline_mode = #tpu.pipeline_mode<synchronous>, transform_indices = @transform_10, window_bounds = array<i64: 96, 3>}, {transform_indices = @transform_11, window_bounds = array<i64: 1, 48, 256>}]} {
    %c0 = arith.constant 0 : index
    %c0_0 = arith.constant 0 : index
    %c0_1 = arith.constant 0 : index
    %0 = vector.load %arg1[%c0, %c0_0, %c0_1] : memref<1x16x256xf32, #tpu.memory_space<vmem>>, vector<1x16x256xf32>
    %1 = vector.shape_cast %0 : vector<1x16x256xf32> to vector<16x256xf32>
    %2 = arith.truncf %1 : vector<16x256xf32> to vector<16x256xbf16>
    %c0_2 = arith.constant 0 : index
    %c0_3 = arith.constant 0 : index
    %3 = vector.load %arg5[%c0_2, %c0_3] : memref<8x16xbf16, #tpu.memory_space<vmem>>, vector<8x16xbf16>
    %cst = arith.constant dense<0.000000e+00> : vector<8x256xf32>
    %4 = tpu.matmul %3, %2, %cst {dimension_numbers = #tpu.dot_dimension_numbers<[1], [0], [0], [1], [0, 0, 1, 1], [], []>} : vector<8x16xbf16>, vector<16x256xbf16>, vector<8x256xf32> -> vector<8x256xf32>
    %c0_4 = arith.constant 0 : index
    %c0_5 = arith.constant 0 : index
    %5 = vector.load %arg6[%c0_4, %c0_5] : memref<8x1xf32, #tpu.memory_space<vmem>>, vector<8x1xf32>
    %6 = vector.broadcast %5 : vector<8x1xf32> to vector<8x256xf32>
    %7 = arith.addf %4, %6 : vector<8x256xf32>
    %c0_6 = arith.constant 0 : index
    %c0_7 = arith.constant 0 : index
    %c0_8 = arith.constant 0 : index
    %8 = vector.load %arg2[%c0_6, %c0_7, %c0_8] : memref<1x64x64xbf16, #tpu.memory_space<vmem>>, vector<1x64x64xbf16>
    %9 = vector.shape_cast %8 : vector<1x64x64xbf16> to vector<64x64xbf16>
    %c0_9 = arith.constant 0 : index
    %c0_10 = arith.constant 0 : index
    %10 = vector.load %arg7[%c0_9, %c0_10] : memref<16x16xbf16, #tpu.memory_space<vmem>>, vector<16x16xbf16>
    %11 = vector.extract_strided_slice %9 {offsets = [0, 0], sizes = [16, 64], strides = [1, 1]} : vector<64x64xbf16> to vector<16x64xbf16>
    %cst_11 = arith.constant dense<0.000000e+00> : vector<16x64xf32>
    %12 = tpu.matmul %10, %11, %cst_11 {dimension_numbers = #tpu.dot_dimension_numbers<[1], [0], [0], [1], [0, 0, 1, 1], [], []>} : vector<16x16xbf16>, vector<16x64xbf16>, vector<16x64xf32> -> vector<16x64xf32>
    %13 = vector.extract_strided_slice %9 {offsets = [16, 0], sizes = [16, 64], strides = [1, 1]} : vector<64x64xbf16> to vector<16x64xbf16>
    %cst_12 = arith.constant dense<0.000000e+00> : vector<16x64xf32>
    %14 = tpu.matmul %10, %13, %cst_12 {dimension_numbers = #tpu.dot_dimension_numbers<[1], [0], [0], [1], [0, 0, 1, 1], [], []>} : vector<16x16xbf16>, vector<16x64xbf16>, vector<16x64xf32> -> vector<16x64xf32>
    %15 = arith.maximumf %12, %14 : vector<16x64xf32>
    %16 = vector.extract_strided_slice %9 {offsets = [32, 0], sizes = [16, 64], strides = [1, 1]} : vector<64x64xbf16> to vector<16x64xbf16>
    %cst_13 = arith.constant dense<0.000000e+00> : vector<16x64xf32>
    %17 = tpu.matmul %10, %16, %cst_13 {dimension_numbers = #tpu.dot_dimension_numbers<[1], [0], [0], [1], [0, 0, 1, 1], [], []>} : vector<16x16xbf16>, vector<16x64xbf16>, vector<16x64xf32> -> vector<16x64xf32>
    %18 = arith.maximumf %15, %17 : vector<16x64xf32>
    %19 = vector.extract_strided_slice %9 {offsets = [48, 0], sizes = [16, 64], strides = [1, 1]} : vector<64x64xbf16> to vector<16x64xbf16>
    %cst_14 = arith.constant dense<0.000000e+00> : vector<16x64xf32>
    %20 = tpu.matmul %10, %19, %cst_14 {dimension_numbers = #tpu.dot_dimension_numbers<[1], [0], [0], [1], [0, 0, 1, 1], [], []>} : vector<16x16xbf16>, vector<16x64xbf16>, vector<16x64xf32> -> vector<16x64xf32>
    %21 = arith.maximumf %18, %20 : vector<16x64xf32>
    %c0_15 = arith.constant 0 : index
    %c0_16 = arith.constant 0 : index
    %22 = vector.load %arg8[%c0_15, %c0_16] : memref<16x1xf32, #tpu.memory_space<vmem>>, vector<16x1xf32>
    %23 = vector.broadcast %22 : vector<16x1xf32> to vector<16x64xf32>
    %24 = arith.addf %21, %23 : vector<16x64xf32>
    %25 = vector.extract_strided_slice %24 {offsets = [0, 0], sizes = [8, 64], strides = [1, 1]} : vector<16x64xf32> to vector<8x64xf32>
    %26 = vector.extract_strided_slice %24 {offsets = [8, 0], sizes = [8, 64], strides = [1, 1]} : vector<16x64xf32> to vector<8x64xf32>
    %cst_17 = arith.constant dense<0.000000e+00> : vector<64x256xf32>
    %27 = tpu.matmul %25, %7, %cst_17 {dimension_numbers = #tpu.dot_dimension_numbers<[0], [0], [1], [1], [0, 1, 1, 1], [], []>} : vector<8x64xf32>, vector<8x256xf32>, vector<64x256xf32> -> vector<64x256xf32>
    %cst_18 = arith.constant dense<0xFF800000> : vector<256xf32>
    %28 = vector.multi_reduction <maximumf>, %27, %cst_18 [0] : vector<64x256xf32> to vector<256xf32>
    %29 = vector.shape_cast %28 : vector<256xf32> to vector<1x256xf32>
    %30 = vector.broadcast %29 : vector<1x256xf32> to vector<64x256xf32>
    %31 = arith.subf %27, %30 : vector<64x256xf32>
    %32 = math.exp %31 : vector<64x256xf32>
    %cst_19 = arith.constant dense<0.000000e+00> : vector<256xf32>
    %33 = vector.multi_reduction <add>, %32, %cst_19 [0] : vector<64x256xf32> to vector<256xf32>
    %34 = vector.shape_cast %33 : vector<256xf32> to vector<1x256xf32>
    %35 = tpu.reciprocal %34 {approx = true} : vector<1x256xf32> -> vector<1x256xf32>
    %36 = vector.broadcast %35 : vector<1x256xf32> to vector<64x256xf32>
    %37 = arith.mulf %32, %36 : vector<64x256xf32>
    %38 = arith.truncf %26 : vector<8x64xf32> to vector<8x64xbf16>
    %39 = arith.truncf %37 : vector<64x256xf32> to vector<64x256xbf16>
    %cst_20 = arith.constant dense<0.000000e+00> : vector<8x256xf32>
    %40 = tpu.matmul %38, %39, %cst_20 {dimension_numbers = #tpu.dot_dimension_numbers<[1], [0], [0], [1], [0, 0, 1, 1], [], []>} : vector<8x64xbf16>, vector<64x256xbf16>, vector<8x256xf32> -> vector<8x256xf32>
    %c0_21 = arith.constant 0 : index
    %c0_22 = arith.constant 0 : index
    %41 = vector.load %arg9[%c0_21, %c0_22] : memref<16x8xbf16, #tpu.memory_space<vmem>>, vector<16x8xbf16>
    %42 = arith.truncf %40 : vector<8x256xf32> to vector<8x256xbf16>
    %cst_23 = arith.constant dense<0.000000e+00> : vector<16x256xf32>
    %43 = tpu.matmul %41, %42, %cst_23 {dimension_numbers = #tpu.dot_dimension_numbers<[1], [0], [0], [1], [0, 0, 1, 1], [], []>} : vector<16x8xbf16>, vector<8x256xbf16>, vector<16x256xf32> -> vector<16x256xf32>
    %c0_24 = arith.constant 0 : index
    %c0_25 = arith.constant 0 : index
    %44 = vector.load %arg10[%c0_24, %c0_25] : memref<16x1xf32, #tpu.memory_space<vmem>>, vector<16x1xf32>
    %45 = vector.broadcast %44 : vector<16x1xf32> to vector<16x256xf32>
    %46 = arith.addf %43, %45 : vector<16x256xf32>
    %47 = arith.addf %46, %1 : vector<16x256xf32>
    %c0_26 = arith.constant 0 : index
    %c0_27 = arith.constant 0 : index
    %c0_28 = arith.constant 0 : index
    %48 = vector.load %arg3[%c0_26, %c0_27, %c0_28] : memref<1x16x256xf32, #tpu.memory_space<vmem>>, vector<1x16x256xf32>
    %49 = vector.shape_cast %48 : vector<1x16x256xf32> to vector<16x256xf32>
    %c0_29 = arith.constant 0 : index
    %c0_30 = arith.constant 0 : index
    %c0_31 = arith.constant 0 : index
    %50 = vector.load %arg4[%c0_29, %c0_30, %c0_31] : memref<1x16x256xf32, #tpu.memory_space<vmem>>, vector<1x16x256xf32>
    %51 = vector.shape_cast %50 : vector<1x16x256xf32> to vector<16x256xf32>
    %cst_32 = arith.constant dense<0.000000e+00> : vector<16xf32>
    %52 = vector.multi_reduction <add>, %49, %cst_32 [1] : vector<16x256xf32> to vector<16xf32>
    %53 = vector.shape_cast %52 : vector<16xf32> to vector<16x1xf32>
    %cst_33 = arith.constant dense<0.000000e+00> : vector<16xf32>
    %54 = vector.multi_reduction <add>, %47, %cst_33 [1] : vector<16x256xf32> to vector<16xf32>
    %55 = vector.shape_cast %54 : vector<16xf32> to vector<16x1xf32>
    %cst_34 = arith.constant dense<0.000000e+00> : vector<16xf32>
    %56 = vector.multi_reduction <add>, %51, %cst_34 [1] : vector<16x256xf32> to vector<16xf32>
    %57 = vector.shape_cast %56 : vector<16xf32> to vector<16x1xf32>
    %58 = tpu.concatenate %53, %55, %57 in 0 : vector<16x1xf32>, vector<16x1xf32>, vector<16x1xf32> -> vector<48x1xf32>
    %cst_35 = arith.constant 3.906250e-03 : f32
    %59 = vector.broadcast %cst_35 : f32 to vector<48x1xf32>
    %60 = arith.mulf %58, %59 : vector<48x1xf32>
    %c0_36 = arith.constant 0 : index
    %c0_37 = arith.constant 0 : index
    %61 = vector.load %arg11[%c0_36, %c0_37] : memref<96x3xf32, #tpu.memory_space<vmem>>, vector<96x3xf32>
    %62 = vector.extract_strided_slice %61 {offsets = [0, 0], sizes = [48, 3], strides = [1, 1]} : vector<96x3xf32> to vector<48x3xf32>
    %63 = vector.extract_strided_slice %61 {offsets = [48, 0], sizes = [48, 3], strides = [1, 1]} : vector<96x3xf32> to vector<48x3xf32>
    %64 = vector.broadcast %60 : vector<48x1xf32> to vector<48x3xf32>
    %65 = arith.mulf %62, %64 : vector<48x3xf32>
    %cst_38 = arith.constant dense<0.000000e+00> : vector<3xf32>
    %66 = vector.multi_reduction <add>, %65, %cst_38 [0] : vector<48x3xf32> to vector<3xf32>
    %67 = vector.shape_cast %66 : vector<3xf32> to vector<1x3xf32>
    %cst_39 = arith.constant 0.000000e+00 : f32
    %68 = vector.broadcast %cst_39 : f32 to vector<1x3xf32>
    %69 = arith.maximumf %67, %68 : vector<1x3xf32>
    %70 = vector.broadcast %69 : vector<1x3xf32> to vector<48x3xf32>
    %71 = arith.mulf %63, %70 : vector<48x3xf32>
    %cst_40 = arith.constant dense<0.000000e+00> : vector<48xf32>
    %72 = vector.multi_reduction <add>, %71, %cst_40 [1] : vector<48x3xf32> to vector<48xf32>
    %73 = vector.shape_cast %72 : vector<48xf32> to vector<48x1xf32>
    %cst_41 = arith.constant 0.000000e+00 : f32
    %74 = vector.broadcast %cst_41 : f32 to vector<48x1xf32>
    %75 = arith.subf %74, %73 : vector<48x1xf32>
    %76 = math.exp %75 : vector<48x1xf32>
    %cst_42 = arith.constant 1.000000e+00 : f32
    %77 = vector.broadcast %cst_42 : f32 to vector<48x1xf32>
    %78 = arith.addf %77, %76 : vector<48x1xf32>
    %cst_43 = arith.constant 1.000000e+00 : f32
    %79 = vector.broadcast %cst_43 : f32 to vector<48x1xf32>
    %80 = arith.divf %79, %78 : vector<48x1xf32>
    %81 = vector.extract_strided_slice %80 {offsets = [0, 0], sizes = [16, 1], strides = [1, 1]} : vector<48x1xf32> to vector<16x1xf32>
    %82 = vector.broadcast %81 : vector<16x1xf32> to vector<16x256xf32>
    %83 = arith.mulf %49, %82 : vector<16x256xf32>
    %c0_44 = arith.constant 0 : index
    %c0_45 = arith.constant 0 : index
    %c0_46 = arith.constant 0 : index
    %84 = vector.load %arg12[%c0_44, %c0_45, %c0_46] : memref<1x48x256xf32, #tpu.memory_space<vmem>>, vector<1x16x256xf32>
    %85 = vector.shape_cast %84 : vector<1x16x256xf32> to vector<16x256xf32>
    %86 = vector.shape_cast %83 : vector<16x256xf32> to vector<1x16x256xf32>
    tpu.vector_store %arg12[%c0_44, %c0_45, %c0_46], %86 {strides = array<i32>} : memref<1x48x256xf32, #tpu.memory_space<vmem>>, vector<1x16x256xf32>,
    %87 = vector.extract_strided_slice %80 {offsets = [16, 0], sizes = [16, 1], strides = [1, 1]} : vector<48x1xf32> to vector<16x1xf32>
    %88 = vector.broadcast %87 : vector<16x1xf32> to vector<16x256xf32>
    %89 = arith.mulf %47, %88 : vector<16x256xf32>
    %c0_47 = arith.constant 0 : index
    %c16 = arith.constant 16 : index
    %c0_48 = arith.constant 0 : index
    %90 = vector.load %arg12[%c0_47, %c16, %c0_48] : memref<1x48x256xf32, #tpu.memory_space<vmem>>, vector<1x16x256xf32>
    %91 = vector.shape_cast %90 : vector<1x16x256xf32> to vector<16x256xf32>
    %92 = vector.shape_cast %89 : vector<16x256xf32> to vector<1x16x256xf32>
    tpu.vector_store %arg12[%c0_47, %c16, %c0_48], %92 {strides = array<i32>} : memref<1x48x256xf32, #tpu.memory_space<vmem>>, vector<1x16x256xf32>,
    %93 = vector.extract_strided_slice %80 {offsets = [32, 0], sizes = [16, 1], strides = [1, 1]} : vector<48x1xf32> to vector<16x1xf32>
    %94 = vector.broadcast %93 : vector<16x1xf32> to vector<16x256xf32>
    %95 = arith.mulf %51, %94 : vector<16x256xf32>
    %c0_49 = arith.constant 0 : index
    %c32 = arith.constant 32 : index
    %c0_50 = arith.constant 0 : index
    %96 = vector.load %arg12[%c0_49, %c32, %c0_50] : memref<1x48x256xf32, #tpu.memory_space<vmem>>, vector<1x16x256xf32>
    %97 = vector.shape_cast %96 : vector<1x16x256xf32> to vector<16x256xf32>
    %98 = vector.shape_cast %95 : vector<16x256xf32> to vector<1x16x256xf32>
    tpu.vector_store %arg12[%c0_49, %c32, %c0_50], %98 {strides = array<i32>} : memref<1x48x256xf32, #tpu.memory_space<vmem>>, vector<1x16x256xf32>,
    return
  }
  func.func @transform_0(%arg0: i32) -> (i32, i32, i32) {
    %c0_i32 = arith.constant 0 : i32
    %c0_i32_0 = arith.constant 0 : i32
    %c0_i32_1 = arith.constant 0 : i32
    return %arg0, %c0_i32, %c0_i32_0 : i32, i32, i32
  }
  func.func @transform_1(%arg0: i32) -> (i32, i32, i32) {
    %c0_i32 = arith.constant 0 : i32
    %c0_i32_0 = arith.constant 0 : i32
    %c0_i32_1 = arith.constant 0 : i32
    return %arg0, %c0_i32, %c0_i32_0 : i32, i32, i32
  }
  func.func @transform_2(%arg0: i32) -> (i32, i32, i32) {
    %c0_i32 = arith.constant 0 : i32
    %c0_i32_0 = arith.constant 0 : i32
    %c0_i32_1 = arith.constant 0 : i32
    return %arg0, %c0_i32, %c0_i32_0 : i32, i32, i32
  }
  func.func @transform_3(%arg0: i32) -> (i32, i32, i32) {
    %c0_i32 = arith.constant 0 : i32
    %c0_i32_0 = arith.constant 0 : i32
    %c0_i32_1 = arith.constant 0 : i32
    return %arg0, %c0_i32, %c0_i32_0 : i32, i32, i32
  }
  func.func @transform_4(%arg0: i32) -> (i32, i32) {
    %c0_i32 = arith.constant 0 : i32
    %c0_i32_0 = arith.constant 0 : i32
    %c0_i32_1 = arith.constant 0 : i32
    return %c0_i32, %c0_i32_0 : i32, i32
  }
  func.func @transform_5(%arg0: i32) -> (i32, i32) {
    %c0_i32 = arith.constant 0 : i32
    %c0_i32_0 = arith.constant 0 : i32
    %c0_i32_1 = arith.constant 0 : i32
    return %c0_i32, %c0_i32_0 : i32, i32
  }
  func.func @transform_6(%arg0: i32) -> (i32, i32) {
    %c0_i32 = arith.constant 0 : i32
    %c0_i32_0 = arith.constant 0 : i32
    %c0_i32_1 = arith.constant 0 : i32
    return %c0_i32, %c0_i32_0 : i32, i32
  }
  func.func @transform_7(%arg0: i32) -> (i32, i32) {
    %c0_i32 = arith.constant 0 : i32
    %c0_i32_0 = arith.constant 0 : i32
    %c0_i32_1 = arith.constant 0 : i32
    return %c0_i32, %c0_i32_0 : i32, i32
  }
  func.func @transform_8(%arg0: i32) -> (i32, i32) {
    %c0_i32 = arith.constant 0 : i32
    %c0_i32_0 = arith.constant 0 : i32
    %c0_i32_1 = arith.constant 0 : i32
    return %c0_i32, %c0_i32_0 : i32, i32
  }
  func.func @transform_9(%arg0: i32) -> (i32, i32) {
    %c0_i32 = arith.constant 0 : i32
    %c0_i32_0 = arith.constant 0 : i32
    %c0_i32_1 = arith.constant 0 : i32
    return %c0_i32, %c0_i32_0 : i32, i32
  }
  func.func @transform_10(%arg0: i32) -> (i32, i32) {
    %c0_i32 = arith.constant 0 : i32
    %c0_i32_0 = arith.constant 0 : i32
    %c0_i32_1 = arith.constant 0 : i32
    return %c0_i32, %c0_i32_0 : i32, i32
  }
  func.func @transform_11(%arg0: i32) -> (i32, i32, i32) {
    %c0_i32 = arith.constant 0 : i32
    %c0_i32_0 = arith.constant 0 : i32
    %c0_i32_1 = arith.constant 0 : i32
    return %arg0, %c0_i32, %c0_i32_0 : i32, i32, i32
  }
}

</mosaic_0001>

<bundles_post_ra>
// kernel: tpu_custom_call.1
= control target key start
LH: loop header
LB: loop body
LE: loop exit
PB: predicated region body
PF: predicated region fallthrough
CT: control target
= control target key end

     0   :  { %s2351_s0 = inlined_call_operand.vmem [shape: f32[2,16,256], index: 0, kind: input, shape index: {}]   ;;  %s2352_s1 = inlined_call_operand.hbm [shape: bf16[2,64,64], index: 1, kind: input, shape index: {}]   ;;  %s2353_s2 = inlined_call_operand.hbm [shape: f32[2,16,256], index: 2, kind: input, shape index: {}]   ;;  %s2354_s3 = inlined_call_operand.hbm [shape: f32[2,16,256], index: 3, kind: input, shape index: {}]   ;;  %s2355_s4 = inlined_call_operand.vmem [shape: bf16[8,16], index: 4, kind: input, shape index: {}]   ;;  %s2356_s5 = inlined_call_operand.vmem [shape: f32[8,1], index: 5, kind: input, shape index: {}]   ;;  %s2357_s6 = inlined_call_operand.vmem [shape: bf16[16,16], index: 6, kind: input, shape index: {}]   ;;  %s2358_s7 = inlined_call_operand.vmem [shape: f32[16,1], index: 7, kind: input, shape index: {}]   ;;  %s2359_s8 = inlined_call_operand.vmem [shape: bf16[16,8], index: 8, kind: input, shape index: {}]   ;;  %s2360_s9 = inlined_call_operand.vmem [shape: f32[16,1], index: 9, kind: input, shape index: {}]   ;;  %s2361_s10 = inlined_call_operand.vmem [shape: f32[96,3], index: 10, kind: input, shape index: {}]   ;;  %s2362_s11 = inlined_call_operand.hbm [shape: f32[2,48,256], index: 11, kind: output, shape index: {}]  }
   0x1   :  { %2376 = sst [smem:[#allocation19_spill]] %s2353_s2 }
   0x2   :  { %2377 = sst [smem:[#allocation20_spill]] %s2359_s8 }
   0x3   :  { %2378 = sst [smem:[#allocation21_spill]] %s2361_s10 }
   0x4   :  { %2379 = sst [smem:[#allocation22_spill]] %s2362_s11 }
   0x5   :  { %16 = vsyncpa [#allocation3], 0 }
   0x6   :  { %18 = vsyncpa [#allocation3 + $0x1], 0 }
   0x7   :  { %19 = vsyncpa [#allocation6], 0 }
   0x8   :  { %21 = vsyncpa [#allocation6 + $0x1], 0 }
   0x9   :  { %22 = vsyncpa [#allocation4], 0 }
   0xa   :  { %24 = vsyncpa [#allocation4 + $0x1], 0  ;;  %s1873_s17 = smov 0   ;;  %s1875_s18 = smov 0  }
   0xb   :  { %s1877_s19 = smov 0   ;;  %s1879_s20 = smov 0  }
   0xc LB: > { %2380 = sst [smem:[#allocation12_spill]] %s1792_s17  ;;  %s1894_s21 = sadd.s32 4294967295, %s1804_s20   ;;  %s1804_s20 = sphi %s1879_s20, %s2405_s20   ;;  %s1800_s19 = sphi %s1877_s19, %s2407_s19   ;;  %s1796_s18 = sphi %s1875_s18, %s2409_s18   ;;  %s1792_s17 = sphi %s1873_s17, %s2408_s17  }
   0xd   : > { %2381 = sst [smem:[#allocation13_spill]] %s1800_s19  ;;  %s1434_s22 = sadd.s32 4294967294, %s1804_s20  }
   0xe   : > { %2382 = sst [smem:[#allocation14_spill]] %s1804_s20  ;;  %s1898_s23 = sadd.s32 1, %s1804_s20  }
   0xf   : > { %2383 = sst [smem:[#allocation15_spill]] %s1898_s23  ;;  %s63_s24 = sadd.s32 1, %s1800_s19 }
  0x10   : > { %s60_s25 = ssub.s32 %s1804_s20, %s1898_s23  ;;  %p70_p0 = scmp.ne.s32.totalorder %s1800_s19, %s1796_s18 }
  0x11   : > { %p61_p1 = scmp.eq.s32.totalorder %s60_s25, 0  ;;  %p71_p2 = scmp.eq.s32.totalorder %s1804_s20, 0 }
  0x12   : > { %p76_p3 = scmp.ne.s32.totalorder %s1796_s18, %s1792_s17  ;;  %p77_p4 = scmp.eq.s32.totalorder %s1894_s21, 0 }
  0x13   : > { %s1910_s26 = scalar_select %p61_p1, %s1800_s19, %s63_s24  }
  0x14   : > { %p72_p5 = por %p71_p2, %p70_p0  ;;  %p1912_p6 = por %p77_p4, %p76_p3 }
  0x15   : > { %2384 = sst [smem:[#allocation16_spill]] %s1910_s26  ;;  %p299_p7 = scmp.eq.s32.totalorder %s1894_s21, 1 }
  0x16   : > { %p305_p8 = scmp.eq.s32.totalorder %s1434_s22, 1  ;;  %p1436_p9 = scmp.ge.s32.totalorder %s1804_s20, 2 }
  0x17   : > { %p1539_p10 = scmp.lt.s32.totalorder %s1804_s20, 2  ;;  %p1919_p11 = por %p299_p7, %p70_p0 }
  0x18   : > { %p1923_p12 = por %p305_p8, %p76_p3  ;;  %s2365_s30 = sand.u32 1, %s1800_s19  }
  0x19   : > { %s2386_s28 = scalar_select %p1919_p11, 1, 0 }
  0x1a   : > { %s2388_s29 = scalar_select %p1923_p12, 1, 0 }
  0x1b   : > { %2387 = sst [smem:[#allocation17_spill]] %s2386_s28  ;;  %s1929_s12 = sshll.u32 %s1804_s20, 5 }
  0x1c   : > { %2389 = sst [smem:[#allocation18_spill]] %s2388_s29  ;;  %s1933_s13 = sshll.u32 %s2365_s30, 5 }
  0x1d   : > { %p1935_p13 = pnand %p1539_p10, %p72_p5  ;;  %s376_s15 = sand.u32 1, %s1804_s20  }
  0x1e   : > { %s2391_s2 = sld [smem:[#allocation19_spill]]  ;;  %s380_s25 = scalar_lea.vmem [#allocation5], %s1933_s13 }
  0x1f   : > { %s388_s26 = sshll.u32 %s380_s25, 4  ;;  %p1446_p0 = scmp.ge.s32.totalorder %s1804_s20, 1  ;;  %s389_s26 = int_to_ptr.vmem [resolvable:$true] %s388_s26 }
  0x20   : > { %s1946_s30 = scalar_lea.sflag [#allocation6], %s376_s15  ;;  %p1648_p2 = pneg %p1935_p13 }
  0x24   : > { %s385_s24 = scalar_lea.hbm %s2391_s2, %s1929_s12  ;;  %s1651_s25 = scalar_lea.hbm %s2391_s2, 64 }
  0x25   : > { %s386_s23 = sshll.u32 %s385_s24, 4  ;;  %s387_s23 = int_to_ptr.hbm [resolvable:$true] %s386_s23 }
  0x26   : > { %s1644_s29 = sshra.s32 %s387_s23, 4  ;;  %s1645_s29 = int_to_ptr.hbm [resolvable:$true] %s1644_s29 }
  0x27   : > { %s1646_s17 = scalar_lea.hbm %s1645_s29, 32  ;;  %p1652_p5 = scmp.lt.s32.totalorder %s1645_s29, %s2391_s2 }
  0x28   : > { %p1647_p1 = scmp.ne.s32.totalorder %s1645_s29, %s1646_s17  ;;  %p1653_p7 = scmp.lt.s32.totalorder %s1651_s25, %s1646_s17 }
  0x2a   : > { %p1649_p3 = pnand %p1648_p2, %p1647_p1  ;;  %p1654_p8 = por %p1653_p7, %p1652_p5 }
  0x2c   : > { %p1650_p4 = pneg %p1649_p3 }
  0x2e   : > { %p1655_p10 = pnand %p1654_p8, %p1650_p4 }
  0x30   : > { %1658 = shalt.err (!%p1655_p10)
}
  0x31   : > { %s2372_s15 = smov 256   ;;  %s2373_s11 = smov 16  }
  0x32   : > { %1531 = dma.hbm_to_vmem [thread:$0]  (!%p1935_p13), %s387_s23, 512, %s389_s26, %s1946_s30, %s2372_s15, %s2372_s15, %s2373_s11  }
  0x33   : > { %p418_p1 = scmp.lt.s32.totalorder %s1804_s20, 3  ;;  %s363_s29 = scalar_lea.hbm %s2352_s1, %s1929_s12 }
  0x34   : > { %s364_s22 = sshll.u32 %s363_s29, 4  ;;  %s358_s25 = scalar_lea.vmem [#allocation2], %s1933_s13  ;;  %s365_s22 = int_to_ptr.hbm [resolvable:$true] %s364_s22 }
  0x35   : > { %p1972_p3 = pnand %p1446_p0, %p418_p1  ;;  %s366_s24 = sshll.u32 %s358_s25, 4  ;;  %s367_s24 = int_to_ptr.vmem [resolvable:$true] %s366_s24 }
  0x36   : > { %s2393_s2 = sand.u32 1, %s1800_s19   ;;  %s1674_s8 = sshra.s32 %s365_s22, 4  ;;  %s1675_s8 = int_to_ptr.hbm [resolvable:$true] %s1674_s8 }
  0x37   : > { %s355_s10 = scalar_lea.sflag [#allocation3], %s2393_s2  ;;  %s1676_s23 = scalar_lea.hbm %s1675_s8, 32 }
  0x38   : > { %p1677_p4 = scmp.ne.s32.totalorder %s1675_s8, %s1676_s23  ;;  %s1681_s28 = scalar_lea.hbm %s2352_s1, 64 }
  0x39   : > { %p1682_p0 = scmp.lt.s32.totalorder %s1675_s8, %s2352_s1  ;;  %p1683_p8 = scmp.lt.s32.totalorder %s1681_s28, %s1676_s23 }
  0x3a   : > { %p1679_p5 = pnand %p1677_p4, %p1648_p2 }
  0x3b   : > { %p1684_p10 = por %p1683_p8, %p1682_p0 }
  0x3c   : > { %p1680_p7 = pneg %p1679_p5 }
  0x3e   : > { %p1685_p1 = pnand %p1684_p10, %p1680_p7 }
  0x40   : > { %1688 = shalt.err (!%p1685_p1)
}
  0x41   : > { %s1808_s2 = smov 64   ;;  %s1809_s25 = smov 4  }
  0x42   : > { %1528 = dma.hbm_to_vmem [thread:$0]  (!%p1935_p13), %s365_s22, 512, %s367_s24, %s355_s10, %s1808_s2, %s1808_s2, %s1809_s25  }
  0x43   : > { %s407_s26 = scalar_lea.hbm %s2354_s3, %s1929_s12  ;;  %s402_s17 = scalar_lea.vmem [#allocation7], %s1933_s13 }
  0x44   : > { %s410_s20 = sshll.u32 %s402_s17, 4  ;;  %s408_s15 = sshll.u32 %s407_s26, 4  ;;  %s411_s20 = int_to_ptr.vmem [resolvable:$true] %s410_s20  ;;  %s409_s15 = int_to_ptr.hbm [resolvable:$true] %s408_s15 }
  0x45   : > { %s1704_s8 = sshra.s32 %s409_s15, 4  ;;  %s1711_s10 = scalar_lea.hbm %s2354_s3, 64  ;;  %s1705_s8 = int_to_ptr.hbm [resolvable:$true] %s1704_s8 }
  0x46   : > { %s1706_s23 = scalar_lea.hbm %s1705_s8, 32  ;;  %p1712_p0 = scmp.lt.s32.totalorder %s1705_s8, %s2354_s3 }
  0x47   : > { %p1707_p4 = scmp.ne.s32.totalorder %s1705_s8, %s1706_s23  ;;  %p1713_p8 = scmp.lt.s32.totalorder %s1711_s10, %s1706_s23 }
  0x49   : > { %p1709_p5 = pnand %p1707_p4, %p1648_p2  ;;  %p1714_p10 = por %p1713_p8, %p1712_p0 }
  0x4b   : > { %p1710_p7 = pneg %p1709_p5 }
  0x4d   : > { %p1715_p1 = pnand %p1714_p10, %p1710_p7 }
  0x4f   : > { %1718 = shalt.err (!%p1715_p1)
}
  0x50   : > { %s2394_s19 = smov 16   ;;  %s2395_s12 = smov 256  }
  0x51   : > { %1534 = dma.hbm_to_vmem [thread:$0]  (!%p1935_p13), %s409_s15, 512, %s411_s20, %s1946_s30, %s2395_s12, %s2395_s12, %s2394_s19  }
  0x52   : > { %422 = sbr.rel (%p1972_p3) target bundleno = 1392 (0x570), region = 64  ;;  %s2013_s13 = sand.u32 (!%p1972_p3), 1, %s1796_s18  }
  0x53   : > { %s2016_s24 = sshll.u32 (!%p1972_p3), %s2013_s13, 5  ;;  %s425_s2 = scalar_lea.sflag (!%p1972_p3), [#allocation3], %s2013_s13 }
  0x54   : > { %s2020_s25 = scalar_lea.vmem (!%p1972_p3), [#allocation2], %s2016_s24 }
  0x57   : > { %1779 = dma.done.wait (%p1912_p6), %s425_s2, 512  }
  0x58   : > { %1781 = vsyncadd (%p1912_p6), %s425_s2, 4294966784  ;;  %s434_s20 = sand.u32 1, %s1894_s21   ;;  %s2028_s14 = scalar_lea.vmem [#allocation5], %s2016_s24 }
  0x59   : > { %s435_s30 = scalar_lea.sflag [#allocation6], %s434_s20 }
  0x5a   : > { %1783 = dma.done.wait (%p1912_p6), %s435_s30, 1024  }
  0x5b   : > { %1785 = vsyncadd (%p1912_p6), %s435_s30, 4294966272  ;;  %p503_p13 = scmp.lt.s32.totalorder %s1894_s21, 1  ;;  %v1810_v0 = vmov 0   ;;  %v970_v1 = vld [vmem:[%s2360_s9] sm:$0xff]  ;;  %v1510_v9 = vld [vmem:[%s2020_s25 + $0x8] sm:$0xff]  ;;  %vm522_vm0 = vcmask 130048  }
  0x5c   : > { %1583 = vset.pattern.permute.xlu2 %v1810_v0  ;;  %1581 = vset.pattern.permute.xlu0 %v1810_v0  ;;  %v1509_v7 = vld [vmem:[%s2020_s25] sm:$0xff]  ;;  %v1511_v13 = vld [vmem:[%s2020_s25 + $0x10] sm:$0xff]  ;;  %v1512_v14 = vld [vmem:[%s2020_s25 + $0x18] sm:$0xff]  ;;  %s448_s30 = scalar_lea.vmem [#allocation7], %s2016_s24  ;;  %vm702_vm1 = vcmask 64512   ;;  %vm936_vm2 = vcmask 523264  }
  0x5d   : > { %s504_s16 = scalar_select %p503_p13, %s1894_s21, 1  ;;  %974 = vperm.xlu2 %1583, %v970_v1   ;;  %v1513_v10 = vld [vmem:[%s2357_s6] sm:$0xff]  ;;  %583 = vmatpush.bf16.msra.mxu2 %v1509_v7  ;;  %v971_v15 = vld [vmem:[%s2360_s9 + $0x8] sm:$0xff]  ;;  %v2082_v17 = vld [vmem:[%s2028_s14 + $0x10] sm:$0xff]  ;;  %vm990_vm3 = vcmask 1043456   ;;  %vm1109_vm4 = vcmask 23552  }
  0x5e   : > { %v515_v11 = vld [vmem:[%s2355_s4] sm:$0xf]  ;;  %603 = vmatpush.bf16.msra.mxu3 %v1510_v9  ;;  %v2085_v18 = vld [vmem:[%s2028_s14 + $0x18] sm:$0xff]  ;;  %v2093_v21 = vld [vmem:[%s2028_s14 + $0x8] sm:$0xff]  ;;  %s2396_s17 = sld [smem:[#allocation20_spill]]  ;;  %s1515_s10 = smul.u32 96, %s2013_s13 }
  0x5f   : > { %s1508_s26 = sshll.u32 %s504_s16, 5  ;;  %v656_v12 = vld [vmem:[%s2358_s7] sm:$0xff]  ;;  %v1040_v19 = vadd.f32 %v2085_v18, %v2082_v17  ;;  %v2098_v23 = vld [vmem:[%s448_s30 + $0x10] sm:$0xff]  ;;  %v2100_v24 = vld [vmem:[%s448_s30 + $0x18] sm:$0xff]  ;;  %s2397_s23 = sld [smem:[#allocation21_spill]] }
  0x60   : > { %s507_s8 = scalar_lea.vmem %s2351_s0, %s1508_s26  ;;  %660 = vperm.xlu0 %1581, %v656_v12   ;;  %1462 = vmatmul.msk.bf16.vlgmr.msra.gmra.mxu2 %vm522_vm0, %v1513_v10  ;;  %v516_v16 = vld [vmem:[%s2356_s5] sm:$0xff]  ;;  %v1052_v25 = vadd.f32 %v2100_v24, %v2098_v23  ;;  %v2106_v28 = vld [vmem:[%s448_s30 + $0x8] sm:$0xff]  ;;  %s2286_s22 = scalar_lea.vmem [#allocation8], %s1515_s10 }
  0x61   : > { %v2044_v2 = vld [vmem:[%s507_s8] sm:$0xff]  ;;  %v2046_v3 = vld [vmem:[%s507_s8 + $0x10] sm:$0xff]  ;;  %v2050_v5 = vld [vmem:[%s507_s8 + $0x8] sm:$0xff]  ;;  %1467 = vmatmul.msk.bf16.vlgmr.msra.gmra.mxu3 %vm522_vm0, %v1513_v10  ;;  %s1516_s11 = smul.u32 96, %s1894_s21  ;;  %s2400_s2 = sld [smem:[#allocation22_spill]] }
  0x62   : > { %v513_v4 = vpack.c.bf16 %v2046_v3, %v2044_v2  ;;  %v2052_v6 = vld [vmem:[%s507_s8 + $0x18] sm:$0xff]  ;;  %v2090_v20 = vld [vmem:[%s2028_s14] sm:$0xff]  ;;  %v657_v51 = vld [vmem:[%s2358_s7 + $0x8] sm:$0xff]  ;;  %s1303_s21 = sshll.u32 %s2286_s22, 4  ;;  %s1291_s24 = scalar_lea.sflag [#allocation4], %s2013_s13  ;;  %s1304_s21 = int_to_ptr.vmem [resolvable:$true] %s1303_s21 }
  0x63   : > { %v514_v8 = vpack.c.bf16 %v2052_v6, %v2050_v5  ;;  %v1037_v22 = vadd.f32 %v2093_v21, %v2090_v20  ;;  %v2104_v27 = vld [vmem:[%s448_s30] sm:$0xff] }
  0x64   : > { %533 = vmatpush.bf16.msra.mxu0 %v513_v4  ;;  %v1049_v29 = vadd.f32 %v2106_v28, %v2104_v27 }
  0x65   : > { %546 = vmatpush.bf16.msra.mxu1 %v514_v8  ;;  %979 = vperm.xlu2 %1583, %v971_v15  }
  0x67   : > { %1452 = vmatmul.msk.bf16.vlgmr.msra.gmra.mxu0 %vm522_vm0, %v515_v11  ;;  %s1302_s25 = scalar_lea.hbm %s2400_s2, %s1516_s11  ;;  %s1754_s15 = scalar_lea.hbm %s2400_s2, 192 }
  0x68   : > { %1453 = vmatmul.msk.bf16.vlgmr.msra.gmra.mxu1 %vm522_vm0, %v515_v11  ;;  %625 = vmatpush.bf16.msrb.mxu0 %v1511_v13  ;;  %s1305_s30 = sshll.u32 %s1302_s25, 4  ;;  %s1306_s30 = int_to_ptr.hbm [resolvable:$true] %s1305_s30 }
  0x69   : > { %647 = vmatpush.bf16.msrb.mxu1 %v1512_v14  ;;  %519 = vperm.xlu0 %1581, %v516_v16   ;;  %s1748_s14 = sshra.s32 %s1306_s30, 4  ;;  %s1749_s14 = int_to_ptr.hbm [resolvable:$true] %s1748_s14 }
  0x6a   : > { %s1750_s16 = scalar_lea.hbm %s1749_s14, 96  ;;  %p1755_p4 = scmp.lt.s32.totalorder %s1749_s14, %s2400_s2 }
  0x6b   : > { %p1751_p6 = scmp.ne.s32.totalorder %s1749_s14, %s1750_s16  ;;  %p1756_p5 = scmp.lt.s32.totalorder %s1754_s15, %s1750_s16 }
  0x6d   : > { %p1752_p2 = pnand %p1751_p6, %p1919_p11  ;;  %p1757_p7 = por %p1756_p5, %p1755_p4 }
  0x6f   : > { %p1753_p3 = pneg %p1752_p2 }
  0x71   : > { %p1758_p0 = pnand %p1757_p7, %p1753_p3 }
  0x77   : > { %1472 = vmatmul.msk.bf16.vlgmr.msrb.gmra.mxu0 %vm522_vm0, %v1513_v10 }
  0x78   : > { %1477 = vmatmul.msk.bf16.vlgmr.msrb.gmra.mxu1 %vm522_vm0, %v1513_v10 }
  0x8e   : > { %1041 = vadd.xlane.f32.xlu2 %v1040_v19 }
  0x93   : > { %1038 = vadd.xlane.f32.xlu0 %v1037_v22 }
  0x96   : > { %1050 = vadd.xlane.f32.xlu2 %v1049_v29 }
  0x9b   : > { %1053 = vadd.xlane.f32.xlu0 %v1052_v25 }
  0xb7   : > { %v2110_v40 = vpop.permute.xlu2 %974 }
  0xbf   : > { %v2112_v46 = vpop.permute.xlu2 %979 }
  0xd2   : > { %v661_v26 = vpop.permute.xlu0 %660 }
  0xdb   : > { %v520_v30 = vpop.permute.xlu0 %519 }
  0xe3   : > { %v585_v37 = vpop.f32.mrf.mxu2 }
  0xe4   : > { %v535_v31 = vpop.f32.mrf.mxu0  ;;  %v605_v38 = vpop.f32.mrf.mxu3 }
  0xe5   : > { %v536_v32 = vadd.f32 %v535_v31, %v520_v30  ;;  %v548_v33 = vpop.f32.mrf.mxu1  ;;  %v610_v39 = vmax.f32 %v585_v37, %v605_v38 }
  0xe6   : > { %v549_v34 = vadd.f32 %v548_v33, %v520_v30 }
  0xe7   : > { %742 = vmatpush.msrb.mxu2 %v536_v32 }
  0xe8   : > { %783 = vmatpush.msrb.mxu3 %v549_v34 }
  0xeb   : > { %v2134_v60 = vpop.f32.mrf.mxu2 }
  0xec   : > { %v537_v35 = vpop.f32.mrf.mxu0  ;;  %v2136_v61 = vpop.f32.mrf.mxu3 }
  0xed   : > { %v550_v36 = vpop.f32.mrf.mxu1 }
  0xf4   : > { %v627_v41 = vpop.f32.mrf.mxu0 }
  0xf5   : > { %v632_v42 = vmax.f32 %v610_v39, %v627_v41  ;;  %v649_v43 = vpop.f32.mrf.mxu1 }
  0xf7   : > { %v654_v44 = vmax.f32 %v632_v42, %v649_v43 }
  0xf9   : > { %v668_v45 = vadd.f32 %v661_v26, %v654_v44 }
  0xfb   : > { %670 = vxpose.xlu1.b32.start.end [1/1] (short) (narrow) %v668_v45, 64 }
 0x101   : > { %v1042_v47 = vpop.xlane.xlu2 %1041 }
 0x102   : > { %v1056_v48 = vmul.f32 0.00390625, %v1042_v47 }
 0x104   : > { %1080 = vperm.xlu0 %1581, %v1056_v48  }
 0x106   : > { %v1039_v49 = vpop.xlane.xlu0 %1038 }
 0x107   : > { %v1055_v50 = vmul.f32 0.00390625, %v1039_v49 }
 0x109   : > { %1075 = vperm.xlu2 %1583, %v1055_v50  }
 0x14e   : > { %1582 = vset.pattern.permute.xlu1 %v1810_v0 }
 0x18d   : > { %665 = vperm.xlu1 %1582, %v657_v51  }
 0x19f   : > { %v686_v52 = vpop.trf.xlu1 }
 0x1a0   : > { %1478 = vmatmul.msk.f32.vlgmr.msrb.gmra.mxu2 %vm702_vm1, %v686_v52  ;;  %1486 = vmatmul.msk.f32.vlgmr.msrb.gmra.mxu3 %vm702_vm1, %v686_v52 }
 0x1a7   : > { %v687_v53 = vpop.trf.xlu1 }
 0x1a8   : > { %1479 = vmatmul.msk.f32.gmra.mxu2 %vm702_vm1, %v687_v53  ;;  %1487 = vmatmul.msk.f32.gmra.mxu3 %vm702_vm1, %v687_v53 }
 0x1af   : > { %v688_v54 = vpop.trf.xlu1 }
 0x1b0   : > { %1480 = vmatmul.msk.f32.gmra.mxu2 %vm702_vm1, %v688_v54  ;;  %1488 = vmatmul.msk.f32.gmra.mxu3 %vm702_vm1, %v688_v54 }
 0x1b7   : > { %v689_v55 = vpop.trf.xlu1 }
 0x1b8   : > { %1481 = vmatmul.msk.f32.gmra.mxu2 %vm702_vm1, %v689_v55  ;;  %1489 = vmatmul.msk.f32.gmra.mxu3 %vm702_vm1, %v689_v55 }
 0x1bf   : > { %v690_v56 = vpop.trf.xlu1 }
 0x1c0   : > { %1482 = vmatmul.msk.f32.gmra.mxu2 %vm702_vm1, %v690_v56  ;;  %1490 = vmatmul.msk.f32.gmra.mxu3 %vm702_vm1, %v690_v56 }
 0x1c7   : > { %v691_v57 = vpop.trf.xlu1 }
 0x1c8   : > { %1483 = vmatmul.msk.f32.gmra.mxu2 %vm702_vm1, %v691_v57  ;;  %1491 = vmatmul.msk.f32.gmra.mxu3 %vm702_vm1, %v691_v57 }
 0x1cf   : > { %v692_v58 = vpop.trf.xlu1 }
 0x1d0   : > { %1484 = vmatmul.msk.f32.gmra.mxu2 %vm702_vm1, %v692_v58  ;;  %1492 = vmatmul.msk.f32.gmra.mxu3 %vm702_vm1, %v692_v58 }
 0x1d7   : > { %v693_v59 = vpop.trf.xlu1 }
 0x1d8   : > { %1485 = vmatmul.msk.f32.gmra.mxu2 %vm702_vm1, %v693_v59  ;;  %1493 = vmatmul.msk.f32.gmra.mxu3 %vm702_vm1, %v693_v59 }
 0x223   : > { %v744_v62 = vpop.f32.mrf.mxu2  ;;  %v785_v63 = vpop.f32.mrf.mxu3 }
 0x22b   : > { %v747_v0 = vpop.f32.mrf.mxu2  ;;  %v788_v1 = vpop.f32.mrf.mxu3 }
 0x233   : > { %v750_v4 = vpop.f32.mrf.mxu2  ;;  %v2138_v7 = vpop.f32.mrf.mxu3 }
 0x234   : > { %v809_v16 = vmax.f32 %v744_v62, %v750_v4  ;;  %v822_v19 = vmax.f32 %v785_v63, %v2138_v7 }
 0x23b   : > { %v753_v8 = vpop.f32.mrf.mxu2  ;;  %v2140_v9 = vpop.f32.mrf.mxu3 }
 0x23c   : > { %v810_v22 = vmax.f32 %v747_v0, %v753_v8  ;;  %v823_v25 = vmax.f32 %v788_v1, %v2140_v9 }
 0x243   : > { %v756_v10 = vpop.f32.mrf.mxu2  ;;  %v2142_v11 = vpop.f32.mrf.mxu3 }
 0x244   : > { %v811_v26 = vmax.f32 %v809_v16, %v756_v10  ;;  %v824_v29 = vmax.f32 %v822_v19, %v2142_v11 }
 0x24b   : > { %v759_v12 = vpop.f32.mrf.mxu2  ;;  %v2144_v13 = vpop.f32.mrf.mxu3 }
 0x24c   : > { %v812_v30 = vmax.f32 %v810_v22, %v759_v12  ;;  %v825_v31 = vmax.f32 %v823_v25, %v2144_v13 }
 0x253   : > { %v762_v14 = vpop.f32.mrf.mxu2  ;;  %v2146_v15 = vpop.f32.mrf.mxu3 }
 0x254   : > { %v813_v34 = vmax.f32 %v811_v26, %v762_v14  ;;  %v826_v35 = vmax.f32 %v824_v29, %v2146_v15 }
 0x25b   : > { %v765_v32 = vpop.f32.mrf.mxu2  ;;  %v2152_v33 = vpop.f32.mrf.mxu3 }
 0x25c   : > { %v814_v36 = vmax.f32 %v812_v30, %v765_v32  ;;  %v827_v37 = vmax.f32 %v825_v31, %v2152_v33 }
 0x25e   : > { %v815_v38 = vmax.f32 %v813_v34, %v814_v36  ;;  %v828_v39 = vmax.f32 %v826_v35, %v827_v37 }
 0x260   : > { %v816_v41 = vrot.slane %v815_v38, 4  ;;  %v829_v42 = vrot.slane %v828_v39, 4 }
 0x262   : > { %v817_v43 = vmax.f32 %v815_v38, %v816_v41  ;;  %v830_v44 = vmax.f32 %v828_v39, %v829_v42 }
 0x264   : > { %v818_v45 = vrot.slane %v817_v43, 2  ;;  %v831_v47 = vrot.slane %v830_v44, 2 }
 0x266   : > { %v819_v48 = vmax.f32 %v817_v43, %v818_v45  ;;  %v832_v49 = vmax.f32 %v830_v44, %v831_v47 }
 0x268   : > { %v820_v50 = vrot.slane %v819_v48, 1  ;;  %v833_v51 = vrot.slane %v832_v49, 1 }
 0x26a   : > { %v821_v52 = vmax.f32 %v819_v48, %v820_v50  ;;  %v834_v56 = vmax.f32 %v832_v49, %v833_v51 }
 0x26c   : > { %v835_v53 = vsub.f32 %v744_v62, %v821_v52  ;;  %v837_v54 = vsub.f32 %v747_v0, %v821_v52  ;;  %v839_v55 = vsub.f32 %v750_v4, %v821_v52  ;;  %v841_v57 = vsub.f32 %v753_v8, %v821_v52 }
 0x26d   : > { %v843_v58 = vsub.f32 %v756_v10, %v821_v52  ;;  %v845_v19 = vsub.f32 %v759_v12, %v821_v52  ;;  %v836_v25 = vsub.f32 %v785_v63, %v834_v56  ;;  %v838_v29 = vsub.f32 %v788_v1, %v834_v56 }
 0x26e   : > { %v851_v59 = vmul.f32 1.442695, %v835_v53  ;;  %v855_v16 = vmul.f32 1.442695, %v837_v54  ;;  %v859_v22 = vmul.f32 1.442695, %v839_v55  ;;  %v847_v30 = vsub.f32 %v762_v14, %v821_v52 }
 0x26f   : > { %v863_v26 = vmul.f32 1.442695, %v841_v57  ;;  %v867_v31 = vmul.f32 1.442695, %v843_v58  ;;  %v871_v34 = vmul.f32 1.442695, %v845_v19  ;;  %v840_v62 = vsub.f32 %v2138_v7, %v834_v56 }
 0x270   : > { %1584 = vpow2.f32 %v851_v59  ;;  %v849_v0 = vsub.f32 %v765_v32, %v821_v52  ;;  %v853_v4 = vmul.f32 1.442695, %v836_v25  ;;  %v842_v8 = vsub.f32 %v2140_v9, %v834_v56 }
 0x271   : > { %1586 = vpow2.f32 %v855_v16  ;;  %v857_v10 = vmul.f32 1.442695, %v838_v29  ;;  %v875_v12 = vmul.f32 1.442695, %v847_v30  ;;  %v844_v1 = vsub.f32 %v2142_v11, %v834_v56 }
 0x272   : > { %1588 = vpow2.f32 %v859_v22  ;;  %v861_v14 = vmul.f32 1.442695, %v840_v62  ;;  %v879_v36 = vmul.f32 1.442695, %v849_v0  ;;  %v846_v9 = vsub.f32 %v2144_v13, %v834_v56 }
 0x273   : > { %1590 = vpow2.f32 %v863_v26  ;;  %v865_v37 = vmul.f32 1.442695, %v842_v8  ;;  %v848_v41 = vsub.f32 %v2146_v15, %v834_v56  ;;  %v869_v11 = vmul.f32 1.442695, %v844_v1 }
 0x274   : > { %1592 = vpow2.f32 %v867_v31  ;;  %v850_v45 = vsub.f32 %v2152_v33, %v834_v56  ;;  %v873_v13 = vmul.f32 1.442695, %v846_v9 }
 0x275   : > { %1594 = vpow2.f32 %v871_v34  ;;  %v877_v50 = vmul.f32 1.442695, %v848_v41 }
 0x276   : > { %v2158_v35 = vpop.eup %1584  ;;  %1596 = vpow2.f32 %v853_v4  ;;  %v881_v54 = vmul.f32 1.442695, %v850_v45 }
 0x277   : > { %v2160_v63 = vpop.eup %1586  ;;  %1598 = vpow2.f32 %v857_v10 }
 0x278   : > { %v883_v7 = vadd.f32 %v2160_v63, %v2158_v35  ;;  %v2165_v32 = vpop.eup %1588  ;;  %1600 = vpow2.f32 %v875_v12 }
 0x279   : > { %v2169_v39 = vpop.eup %1590  ;;  %1602 = vpow2.f32 %v861_v14 }
 0x27a   : > { %v884_v38 = vadd.f32 %v2165_v32, %v883_v7  ;;  %v1593_v42 = vpop.eup %1592  ;;  %1604 = vpow2.f32 %v879_v36 }
 0x27b   : > { %v1595_v44 = vpop.eup %1594  ;;  %1606 = vpow2.f32 %v865_v37 }
 0x27c   : > { %v885_v43 = vadd.f32 %v2169_v39, %v884_v38  ;;  %v2174_v47 = vpop.eup %1596  ;;  %1608 = vpow2.f32 %v869_v11 }
 0x27d   : > { %v2176_v49 = vpop.eup %1598  ;;  %1610 = vpow2.f32 %v873_v13  ;;  %v629_v13 = vpop.f32.mrf.mxu0 }
 0x27e   : > { %v886_v48 = vadd.f32 %v1593_v42, %v885_v43  ;;  %v1601_v51 = vpop.eup %1600  ;;  %v896_v52 = vadd.f32 %v2176_v49, %v2174_v47  ;;  %1612 = vpow2.f32 %v877_v50 }
 0x27f   : > { %v2180_v53 = vpop.eup %1602  ;;  %1614 = vpow2.f32 %v881_v54 }
 0x280   : > { %v887_v15 = vadd.f32 %v1595_v44, %v886_v48  ;;  %v1605_v55 = vpop.eup %1604  ;;  %v897_v56 = vadd.f32 %v2180_v53, %v896_v52  ;;  %v611_v48 = vmax.f32 %v2134_v60, %v2136_v61 }
 0x281   : > { %v1607_v57 = vpop.eup %1606 }
 0x282   : > { %v888_v33 = vadd.f32 %v1601_v51, %v887_v15  ;;  %v898_v59 = vadd.f32 %v1607_v57, %v897_v56  ;;  %v1609_v16 = vpop.eup %1608 }
 0x283   : > { %v1611_v25 = vpop.eup %1610 }
 0x284   : > { %v889_v58 = vadd.f32 %v1605_v55, %v888_v33  ;;  %v899_v22 = vadd.f32 %v1609_v16, %v898_v59  ;;  %v1613_v30 = vpop.eup %1612  ;;  %v633_v33 = vmax.f32 %v611_v48, %v629_v13 }
 0x285   : > { %v1615_v62 = vpop.eup %1614 }
 0x286   : > { %v890_v19 = vrot.slane %v889_v58, 4  ;;  %v900_v29 = vadd.f32 %v1611_v25, %v899_v22 }
 0x288   : > { %v891_v26 = vadd.f32 %v890_v19, %v889_v58  ;;  %v901_v34 = vadd.f32 %v1613_v30, %v900_v29 }
 0x28a   : > { %v892_v31 = vrot.slane %v891_v26, 2  ;;  %v902_v4 = vadd.f32 %v1615_v62, %v901_v34 }
 0x28c   : > { %v893_v0 = vadd.f32 %v892_v31, %v891_v26  ;;  %v903_v10 = vrot.slane %v902_v4, 4 }
 0x28e   : > { %v894_v8 = vrot.slane %v893_v0, 1  ;;  %v904_v1 = vadd.f32 %v903_v10, %v902_v4 }
 0x290   : > { %v895_v12 = vadd.f32 %v894_v8, %v893_v0  ;;  %v905_v14 = vrot.slane %v904_v1, 2 }
 0x292   : > { %1616 = vrcp.f32 %v895_v12  ;;  %v906_v36 = vadd.f32 %v905_v14, %v904_v1 }
 0x294   : > { %v907_v7 = vrot.slane %v906_v36, 1 }
 0x296   : > { %v908_v37 = vadd.f32 %v907_v7, %v906_v36 }
 0x298   : > { %v1617_v9 = vpop.eup %1616  ;;  %1618 = vrcp.f32 %v908_v37 }
 0x299   : > { %v925_v38 = vmul.f32 %v1617_v9, %v1605_v55  ;;  %v923_v41 = vmul.f32 %v1617_v9, %v1601_v51  ;;  %v919_v43 = vmul.f32 %v1617_v9, %v1593_v42  ;;  %v921_v45 = vmul.f32 %v1617_v9, %v1595_v44  ;;  %v651_v44 = vpop.f32.mrf.mxu1  ;;  %v666_v55 = vpop.permute.xlu1 %665 }
 0x29a   : > { %v915_v15 = vmul.f32 %v1617_v9, %v2165_v32  ;;  %v917_v52 = vmul.f32 %v1617_v9, %v2169_v39  ;;  %v911_v51 = vmul.f32 %v1617_v9, %v2158_v35  ;;  %v913_v42 = vmul.f32 %v1617_v9, %v2160_v63 }
 0x29b   : > { %v934_v11 = vpack.c.bf16 %v925_v38, %v923_v41  ;;  %v932_v50 = vpack.c.bf16 %v921_v45, %v919_v43  ;;  %v655_v61 = vmax.f32 %v633_v33, %v651_v44  ;;  %v1054_v45 = vpop.xlane.xlu0 %1053  ;;  %v1062_v33 = vld [vmem:[%s2397_s23 + $0x8] sm:$0xff] }
 0x29c   : > { %v930_v60 = vpack.c.bf16 %v917_v52, %v915_v15 }
 0x29d   : > { %944 = vmatpush.bf16.msra.mxu0 %v934_v11  ;;  %v669_v32 = vadd.f32 %v666_v55, %v655_v61 }
 0x29e   : > { %v1619_v54 = vpop.eup %1618 }
 0x29f   : > { %v926_v56 = vmul.f32 %v1619_v54, %v1615_v62  ;;  %v924_v58 = vmul.f32 %v1619_v54, %v1613_v30  ;;  %v920_v19 = vmul.f32 %v1619_v54, %v1609_v16  ;;  %v922_v22 = vmul.f32 %v1619_v54, %v1611_v25 }
 0x2a0   : > { %v916_v26 = vmul.f32 %v1619_v54, %v2180_v53  ;;  %v918_v29 = vmul.f32 %v1619_v54, %v1607_v57  ;;  %v928_v30 = vpack.c.bf16 %v913_v42, %v911_v51  ;;  %v927_v35 = vpack.c.bf16 %v669_v32, %v669_v32  ;;  %v1514_v57 = vld [vmem:[%s2396_s17] sm:$0xff]  ;;  %v1063_v42 = vld [vmem:[%s2397_s23 + $0x10] sm:$0xff] }
 0x2a1   : > { %945 = vmatpush.bf16.msra.mxu0 %v932_v50  ;;  %v935_v59 = vpack.c.bf16 %v926_v56, %v924_v58  ;;  %v933_v39 = vpack.c.bf16 %v922_v22, %v920_v19  ;;  %v912_v31 = vmul.f32 %v1619_v54, %v2174_v47  ;;  %v914_v16 = vmul.f32 %v1619_v54, %v2176_v49  ;;  %v1064_v22 = vld [vmem:[%s2397_s23 + $0x18] sm:$0xff] }
 0x2a2   : > { %v931_v63 = vpack.c.bf16 %v918_v29, %v916_v26 }
 0x2a3   : > { %957 = vmatpush.bf16.msra.mxu1 %v935_v59  ;;  %v929_v25 = vpack.c.bf16 %v914_v16, %v912_v31  ;;  %v1081_v48 = vpop.permute.xlu0 %1080 }
 0x2a4   : > { %v1104_v51 = vmul.f32 %v1081_v48, %v1062_v33 }
 0x2a5   : > { %946 = vmatpush.bf16.msra.mxu0 %v930_v60 }
 0x2a6   : > { %v1111_v59 = vsel %vm1109_vm4, %v1104_v51, 0.0 }
 0x2a7   : > { %958 = vmatpush.bf16.msra.mxu1 %v933_v39  ;;  %v1066_v39 = vld [vmem:[%s2397_s23 + $0x28] sm:$0xff] }
 0x2a9   : > { %947 = vmatpush.bf16.msra.mxu0 %v928_v30  ;;  %v1065_v30 = vld [vmem:[%s2397_s23 + $0x20] sm:$0xff] }
 0x2ab   : > { %959 = vmatpush.bf16.msra.mxu1 %v931_v63 }
 0x2ac   : > { %1494 = vmatmul.msk.bf16.vlgmr.msra.gmra.mxu0 %vm936_vm2, %v927_v35 }
 0x2af   : > { %960 = vmatpush.bf16.msra.mxu1 %v929_v25 }
 0x2b2   : > { %1495 = vmatmul.msk.bf16.vlgmr.msra.gmra.mxu1 %vm936_vm2, %v927_v35 }
 0x329   : > { %v949_v34 = vpop.f32.mrf.mxu0 }
 0x32a   : > { %v968_v62 = vpack.c.bf16 %v949_v34, %v949_v34 }
 0x32c   : > { %v992_v53 = vsel %vm990_vm3, %v968_v62, 0 }
 0x32d   : > { %1004 = vmatpush.bf16.msrb.mxu0 %v992_v53 }
 0x32f   : > { %v962_v0 = vpop.f32.mrf.mxu1 }
 0x330   : > { %1500 = vmatmul.msk.bf16.vlgmr.msrb.gmra.mxu0 %vm702_vm1, %v1514_v57  ;;  %v969_v4 = vpack.c.bf16 %v962_v0, %v962_v0 }
 0x331   : > { %v951_v47 = vpop.f32.mrf.mxu0 }
 0x332   : > { %v995_v49 = vsel %vm990_vm3, %v969_v4, 0 }
 0x333   : > { %1018 = vmatpush.bf16.msrb.mxu1 %v995_v49 }
 0x336   : > { %1501 = vmatmul.msk.bf16.vlgmr.msrb.gmra.mxu1 %vm702_vm1, %v1514_v57 }
 0x337   : > { %v964_v8 = vpop.f32.mrf.mxu1 }
 0x3ad   : > { %v1006_v10 = vpop.f32.mrf.mxu0 }
 0x3ae   : > { %v1007_v12 = vadd.f32 %v1006_v10, %v2110_v40 }
 0x3b0   : > { %v2199_v14 = vadd.f32 %v1007_v12, %v2044_v2  ;;  %v1070_v12 = vld [vmem:[%s2397_s23 + $0x48] sm:$0xff] }
 0x3b3   : > { %v1020_v1 = vpop.f32.mrf.mxu1 }
 0x3b4   : > { %v1021_v36 = vadd.f32 %v1020_v1, %v2110_v40  ;;  %v1068_v1 = vld [vmem:[%s2397_s23 + $0x38] sm:$0xff] }
 0x3b5   : > { %v1008_v7 = vpop.f32.mrf.mxu0 }
 0x3b6   : > { %v2203_v9 = vadd.f32 %v1021_v36, %v2050_v5  ;;  %v1009_v38 = vadd.f32 %v1008_v7, %v2112_v46  ;;  %v1051_v5 = vpop.xlane.xlu2 %1050  ;;  %v1067_v36 = vld [vmem:[%s2397_s23 + $0x30] sm:$0xff] }
 0x3b7   : > { %v1059_v54 = vmul.f32 0.00390625, %v1051_v5 }
 0x3b8   : > { %v1043_v37 = vadd.f32 %v2203_v9, %v2199_v14  ;;  %v2209_v11 = vadd.f32 %v1009_v38, %v2046_v3 }
 0x3ba   : > { %1044 = vadd.xlane.f32.xlu2 %v1043_v37 }
 0x3bb   : > { %v1022_v41 = vpop.f32.mrf.mxu1 }
 0x3bc   : > { %v1023_v43 = vadd.f32 %v1022_v41, %v2112_v46  ;;  %v1060_v46 = vmul.f32 0.00390625, %v1054_v45  ;;  %v1071_v45 = vld [vmem:[%s2397_s23 + $0x50] sm:$0xff] }
 0x3be   : > { %v2213_v2 = vadd.f32 %v1023_v43, %v2052_v6  ;;  %v1076_v13 = vpop.permute.xlu2 %1075  ;;  %v1061_v6 = vld [vmem:[%s2397_s23] sm:$0xff] }
 0x3bf   : > { %v1103_v58 = vmul.f32 %v1076_v13, %v1061_v6  ;;  %v1069_v13 = vld [vmem:[%s2397_s23 + $0x40] sm:$0xff] }
 0x3c0   : > { %v1046_v40 = vadd.f32 %v2213_v2, %v2209_v11 }
 0x3c1   : > { %v1110_v55 = vsel %vm1109_vm4, %v1103_v58, 0.0 }
 0x3c2   : > { %1047 = vadd.xlane.f32.xlu0 %v1046_v40  ;;  %v1112_v61 = vadd.f32 %v1111_v59, %v1110_v55 }
 0x42d   : > { %v1045_v50 = vpop.xlane.xlu2 %1044 }
 0x42e   : > { %v1057_v15 = vmul.f32 0.00390625, %v1045_v50 }
 0x430   : > { %1085 = vperm.xlu0 %1581, %v1057_v15  }
 0x435   : > { %v1048_v52 = vpop.xlane.xlu0 %1047 }
 0x436   : > { %v1058_v3 = vmul.f32 0.00390625, %v1048_v52 }
 0x438   : > { %1090 = vperm.xlu2 %1583, %v1058_v3   ;;  %1095 = vperm.xlu0 %1581, %v1059_v54   ;;  %v1072_v54 = vld [vmem:[%s2397_s23 + $0x58] sm:$0xff] }
 0x440   : > { %1100 = vperm.xlu2 %1583, %v1060_v46  }
 0x492   : > { %v1091_v56 = vpop.permute.xlu2 %1090 }
 0x493   : > { %v1106_v32 = vmul.f32 %v1091_v56, %v1064_v22 }
 0x495   : > { %v1115_v63 = vsel %vm1109_vm4, %v1106_v32, 0.0 }
 0x49a   : > { %v1101_v26 = vpop.permute.xlu2 %1100 }
 0x49b   : > { %v1108_v31 = vmul.f32 %v1101_v26, %v1066_v39 }
 0x49d   : > { %v1119_v53 = vsel %vm1109_vm4, %v1108_v31, 0.0 }
 0x4a2   : > { %v1086_v44 = vpop.permute.xlu0 %1085 }
 0x4a3   : > { %v1105_v19 = vmul.f32 %v1086_v44, %v1063_v42 }
 0x4a5   : > { %v1113_v60 = vsel %vm1109_vm4, %v1105_v19, 0.0 }
 0x4a6   : > { %v1114_v29 = vadd.f32 %v1113_v60, %v1112_v61 }
 0x4a8   : > { %v1116_v25 = vadd.f32 %v1115_v63, %v1114_v29 }
 0x4aa   : > { %v1096_v35 = vpop.permute.xlu0 %1095 }
 0x4ab   : > { %v1107_v16 = vmul.f32 %v1096_v35, %v1065_v30 }
 0x4ad   : > { %v1117_v34 = vsel %vm1109_vm4, %v1107_v16, 0.0 }
 0x4ae   : > { %v1118_v62 = vadd.f32 %v1117_v34, %v1116_v25 }
 0x4b0   : > { %v1120_v57 = vadd.f32 %v1119_v53, %v1118_v62 }
 0x4b2   : > { %v1121_v0 = vrot.slane %v1120_v57, 4 }
 0x4b4   : > { %v1122_v47 = vadd.f32 %v1121_v0, %v1120_v57 }
 0x4b6   : > { %v1123_v4 = vrot.slane %v1122_v47, 2 }
 0x4b8   : > { %v1124_v49 = vadd.f32 %v1123_v4, %v1122_v47 }
 0x4ba   : > { %v1125_v8 = vrot.slane %v1124_v49, 1 }
 0x4bc   : > { %v1126_v10 = vadd.f32 %v1125_v8, %v1124_v49 }
 0x4be   : > { %v1127_v7 = vmax.f32 %v1126_v10, 0.0 }
 0x4c0   : > { %v1131_v37 = vmul.f32 %v1127_v7, %v1070_v12  ;;  %v1129_v38 = vmul.f32 %v1127_v7, %v1068_v1  ;;  %v1128_v41 = vmul.f32 %v1127_v7, %v1067_v36  ;;  %v1132_v48 = vmul.f32 %v1127_v7, %v1071_v45 }
 0x4c1   : > { %v1130_v50 = vmul.f32 %v1127_v7, %v1069_v13  ;;  %v1133_v3 = vmul.f32 %v1127_v7, %v1072_v54 }
 0x4c2   : > { %v1143_v43 = vsel %vm1109_vm4, %v1131_v37, 0.0  ;;  %v1137_v40 = vsel %vm1109_vm4, %v1129_v38, 0.0  ;;  %v1134_v5 = vsel %vm1109_vm4, %v1128_v41, 0.0  ;;  %v1146_v15 = vsel %vm1109_vm4, %v1132_v48, 0.0 }
 0x4c3   : > { %1144 = vadd.xlane.f32.xlu1 %v1143_v43  ;;  %1138 = vadd.xlane.f32.xlu2 %v1137_v40  ;;  %v1140_v52 = vsel %vm1109_vm4, %v1130_v50, 0.0  ;;  %v1149_v46 = vsel %vm1109_vm4, %v1133_v3, 0.0 }
 0x4c4   : > { %1135 = vadd.xlane.f32.xlu0 %v1134_v5 }
 0x4cb   : > { %1147 = vadd.xlane.f32.xlu2 %v1146_v15 }
 0x4cc   : > { %1141 = vadd.xlane.f32.xlu0 %v1140_v52 }
 0x4d4   : > { %1150 = vadd.xlane.f32.xlu0 %v1149_v46 }
 0x536   : > { %v1145_v6 = vpop.xlane.xlu1 %1144  ;;  %v1139_v33 = vpop.xlane.xlu2 %1138 }
 0x537   : > { %v1155_v56 = vsub.f32 0.0, %v1145_v6  ;;  %v1153_v58 = vsub.f32 0.0, %v1139_v33  ;;  %v1136_v51 = vpop.xlane.xlu0 %1135 }
 0x538   : > { %v1152_v42 = vsub.f32 0.0, %v1136_v51 }
 0x539   : > { %v1164_v44 = vmul.f32 1.442695, %v1155_v56  ;;  %v1160_v55 = vmul.f32 1.442695, %v1153_v58 }
 0x53a   : > { %v1158_v59 = vmul.f32 1.442695, %v1152_v42 }
 0x53b   : > { %1620 = vpow2.f32 %v1164_v44 }
 0x53c   : > { %1622 = vpow2.f32 %v1160_v55 }
 0x53d   : > { %1624 = vpow2.f32 %v1158_v59 }
 0x53e   : > { %v1148_v19 = vpop.xlane.xlu2 %1147 }
 0x53f   : > { %v1156_v22 = vsub.f32 0.0, %v1148_v19  ;;  %v1142_v60 = vpop.xlane.xlu0 %1141 }
 0x540   : > { %v1154_v61 = vsub.f32 0.0, %v1142_v60 }
 0x541   : > { %v1621_v32 = vpop.eup %1620  ;;  %v1166_v39 = vmul.f32 1.442695, %v1156_v22 }
 0x542   : > { %v1623_v26 = vpop.eup %1622  ;;  %v1173_v29 = vadd.f32 1.0, %v1621_v32  ;;  %v1162_v30 = vmul.f32 1.442695, %v1154_v61 }
 0x543   : > { %v1625_v35 = vpop.eup %1624  ;;  %v1171_v63 = vadd.f32 1.0, %v1623_v26  ;;  %1626 = vpow2.f32 %v1166_v39 }
 0x544   : > { %1628 = vrcp.f32 %v1173_v29  ;;  %v1170_v31 = vadd.f32 1.0, %v1625_v35  ;;  %vm1226_vm5 = vweird.f32 %v1173_v29  ;;  %v1230_v49 = vand.u32 2147483647, %v1173_v29 }
 0x545   : > { %1630 = vrcp.f32 %v1171_v63  ;;  %v1232_v12 = vand.u32 2147483648, %v1173_v29  ;;  %vm1196_vm6 = vweird.f32 %v1171_v63  ;;  %v1200_v37 = vand.u32 2147483647, %v1171_v63 }
 0x546   : > { %1632 = vpow2.f32 %v1162_v30  ;;  %v1202_v38 = vand.u32 2147483648, %v1171_v63  ;;  %v1185_v40 = vand.u32 2147483647, %v1170_v31  ;;  %v1187_v45 = vand.u32 2147483648, %v1170_v31 }
 0x547   : > { %v1151_v16 = vpop.xlane.xlu0 %1150  ;;  %1634 = vrcp.f32 %v1170_v31  ;;  %vm1231_vm9 = vcmp.eq.f32.partialorder %v1230_v49, 8.507059e+37  ;;  %v1233_v48 = vor.u32 1.1754944e-38, %v1232_v12  ;;  %vm1201_vm11 = vcmp.eq.f32.partialorder %v1200_v37, 8.507059e+37 }
 0x548   : > { %v1157_v34 = vsub.f32 0.0, %v1151_v16  ;;  %v1203_v54 = vor.u32 1.1754944e-38, %v1202_v38  ;;  %vm1181_vm12 = vweird.f32 %v1170_v31  ;;  %vm2275_vm15 = vcmp.eq.f32.partialorder %v1185_v40, 8.507059e+37 }
 0x549   : > { %v1627_v25 = vpop.eup %1626  ;;  %v1188_v42 = vor.u32 1.1754944e-38, %v1187_v45 }
 0x54a   : > { %v1629_v62 = vpop.eup %1628  ;;  %v2265_v53 = vadd.f32 1.0, %v1627_v25  ;;  %v1168_v47 = vmul.f32 1.442695, %v1157_v34 }
 0x54b   : > { %v1631_v57 = vpop.eup %1630  ;;  %v1222_v0 = vmul.f32 %v1629_v62, %v1173_v29  ;;  %vm1227_vm7 = vweird.f32 %v1629_v62 }
 0x54c   : > { %v1633_v4 = vpop.eup %1632  ;;  %v1192_v8 = vmul.f32 %v1631_v57, %v1171_v63  ;;  %1636 = vrcp.f32 %v2265_v53  ;;  %vm1197_vm8 = vweird.f32 %v1631_v57  ;;  %vm1228_vm10 = vmor %vm1226_vm5, %vm1227_vm7  ;;  %vm1241_vm2 = vweird.f32 %v2265_v53 }
 0x54d   : > { %v1223_v10 = vsub.f32 1.0, %v1222_v0  ;;  %v2268_v1 = vadd.f32 1.0, %v1633_v4  ;;  %v1635_v36 = vpop.eup %1634  ;;  %1638 = vpow2.f32 %v1168_v47  ;;  %vm1198_vm13 = vmor %vm1196_vm6, %vm1197_vm8 }
 0x54e   : > { %v1193_v7 = vsub.f32 1.0, %v1192_v8  ;;  %v1177_v43 = vmul.f32 %v1635_v36, %v1170_v31  ;;  %vm1182_vm14 = vweird.f32 %v1635_v36 }
 0x54f   : > { %v1224_v41 = vmul.f32 %v1629_v62, %v1223_v10  ;;  %1640 = vrcp.f32 %v2268_v1  ;;  %vm1183_vm0 = vmor %vm1181_vm12, %vm1182_vm14  ;;  %v1217_v16 = vand.u32 2147483648, %v2268_v1  ;;  %vm1211_vm6 = vweird.f32 %v2268_v1 }
 0x550   : > { %v1194_v5 = vmul.f32 %v1631_v57, %v1193_v7  ;;  %v1178_v50 = vsub.f32 1.0, %v1177_v43 }
 0x551   : > { %v1225_v13 = vadd.f32 %v1629_v62, %v1224_v41  ;;  %v1218_v4 = vor.u32 1.1754944e-38, %v1217_v16 }
 0x552   : > { %v1637_v15 = vpop.eup %1636  ;;  %v1195_v52 = vadd.f32 %v1631_v57, %v1194_v5  ;;  %v1179_v46 = vmul.f32 %v1635_v36, %v1178_v50 }
 0x553   : > { %v1229_v3 = vsel %vm1228_vm10, %v1629_v62, %v1225_v13  ;;  %v1237_v6 = vmul.f32 %v1637_v15, %v2265_v53  ;;  %v1639_v33 = vpop.eup %1638  ;;  %vm1242_vm1 = vweird.f32 %v1637_v15  ;;  %v1215_v62 = vand.u32 2147483647, %v2268_v1 }
 0x554   : > { %v1234_v56 = vsel %vm1231_vm9, %v1233_v48, %v1229_v3  ;;  %v1199_v58 = vsel %vm1198_vm13, %v1631_v57, %v1195_v52  ;;  %v1180_v19 = vadd.f32 %v1635_v36, %v1179_v46  ;;  %v1175_v39 = vadd.f32 1.0, %v1639_v33  ;;  %vm1243_vm3 = vmor %vm1241_vm2, %vm1242_vm1 }
 0x555   : > { %v1276_v44 = vmul.f32 %v1234_v56, %v2209_v11  ;;  %v1277_v55 = vmul.f32 %v1234_v56, %v2213_v2  ;;  %v1204_v59 = vsel %vm1201_vm11, %v1203_v54, %v1199_v58  ;;  %v1641_v22 = vpop.eup %1640  ;;  %v1238_v32 = vsub.f32 1.0, %v1237_v6 }
 0x556   : > { %v1268_v60 = vmul.f32 %v1204_v59, %v2082_v17  ;;  %v1269_v61 = vmul.f32 %v1204_v59, %v2085_v18  ;;  %v1184_v11 = vsel %vm1183_vm0, %v1635_v36, %v1180_v19  ;;  %v1245_v2 = vand.u32 2147483647, %v2265_v53 }
 0x557   : > { %1280 = vst [vmem:[%s2286_s22 + $0x30] sm:$0xff] %v1276_v44  ;;  %v1247_v17 = vand.u32 2147483648, %v2265_v53  ;;  %v1207_v18 = vmul.f32 %v1641_v22, %v2268_v1  ;;  %v1189_v26 = vsel %vm2275_vm15, %v1188_v42, %v1184_v11  ;;  %v1239_v29 = vmul.f32 %v1637_v15, %v1238_v32 }
 0x558   : > { %1281 = vst [vmem:[%s2286_s22 + $0x38] sm:$0xff] %v1277_v55  ;;  %1642 = vrcp.f32 %v1175_v39  ;;  %v1266_v30 = vmul.f32 %v1189_v26, %v2090_v20  ;;  %v1267_v35 = vmul.f32 %v1189_v26, %v2093_v21  ;;  %vm1212_vm4 = vweird.f32 %v1641_v22 }
 0x559   : > { %1272 = vst [vmem:[%s2286_s22 + $0x10] sm:$0xff] %v1268_v60  ;;  %v1208_v63 = vsub.f32 1.0, %v1207_v18  ;;  %v1240_v31 = vadd.f32 %v1637_v15, %v1239_v29  ;;  %v1248_v25 = vor.u32 1.1754944e-38, %v1247_v17  ;;  %vm1246_vm5 = vcmp.eq.f32.partialorder %v1245_v2, 8.507059e+37  ;;  %vm1213_vm7 = vmor %vm1211_vm6, %vm1212_vm4 }
 0x55a   : > { %1273 = vst [vmem:[%s2286_s22 + $0x18] sm:$0xff] %v1269_v61  ;;  %vm1216_vm8 = vcmp.eq.f32.partialorder %v1215_v62, 8.507059e+37  ;;  %v1262_v7 = vand.u32 2147483648, %v1175_v39  ;;  %vm1256_vm10 = vweird.f32 %v1175_v39 }
 0x55b   : > { %1270 = vst [vmem:[%s2286_s22] sm:$0xff] %v1266_v30  ;;  %v1209_v34 = vmul.f32 %v1641_v22, %v1208_v63  ;;  %v1244_v20 = vsel %vm1243_vm3, %v1637_v15, %v1240_v31 }
 0x55c   : > { %1271 = vst [vmem:[%s2286_s22 + $0x8] sm:$0xff] %v1267_v35  ;;  %v1249_v21 = vsel %vm1246_vm5, %v1248_v25, %v1244_v20 }
 0x55d   : > { %v1210_v57 = vadd.f32 %v1641_v22, %v1209_v34  ;;  %v1282_v0 = vmul.f32 %v1249_v21, %v2104_v27  ;;  %v1283_v47 = vmul.f32 %v1249_v21, %v2106_v28  ;;  %v1260_v28 = vand.u32 2147483647, %v1175_v39 }
 0x55e   : > { %v1643_v53 = vpop.eup %1642 }
 0x55f   : > { %v1214_v49 = vsel %vm1213_vm7, %v1641_v22, %v1210_v57  ;;  %v1252_v8 = vmul.f32 %v1643_v53, %v1175_v39  ;;  %1286 = vst [vmem:[%s2286_s22 + $0x40] sm:$0xff] %v1282_v0  ;;  %vm1257_vm9 = vweird.f32 %v1643_v53  ;;  %vm1261_vm12 = vcmp.eq.f32.partialorder %v1260_v28, 8.507059e+37 }
 0x560   : > { %v1219_v10 = vsel %vm1216_vm8, %v1218_v4, %v1214_v49  ;;  %1287 = vst [vmem:[%s2286_s22 + $0x48] sm:$0xff] %v1283_v47  ;;  %vm1258_vm11 = vmor %vm1256_vm10, %vm1257_vm9 }
 0x561   : > { %v1274_v12 = vmul.f32 %v1219_v10, %v2199_v14  ;;  %v1275_v1 = vmul.f32 %v1219_v10, %v2203_v9  ;;  %v1253_v36 = vsub.f32 1.0, %v1252_v8  ;;  %v1263_v14 = vor.u32 1.1754944e-38, %v1262_v7 }
 0x563   : > { %1278 = vst [vmem:[%s2286_s22 + $0x20] sm:$0xff] %v1274_v12  ;;  %v1254_v27 = vmul.f32 %v1643_v53, %v1253_v36 }
 0x564   : > { %1279 = vst [vmem:[%s2286_s22 + $0x28] sm:$0xff] %v1275_v1 }
 0x565   : > { %v1255_v37 = vadd.f32 %v1643_v53, %v1254_v27 }
 0x567   : > { %v1259_v9 = vsel %vm1258_vm11, %v1643_v53, %v1255_v37 }
 0x568   : > { %v1264_v38 = vsel %vm1261_vm12, %v1263_v14, %v1259_v9 }
 0x569   : > { %v1284_v41 = vmul.f32 %v1264_v38, %v2098_v23  ;;  %v1285_v43 = vmul.f32 %v1264_v38, %v2100_v24 }
 0x56b   : > { %1288 = vst [vmem:[%s2286_s22 + $0x50] sm:$0xff] %v1284_v41 }
 0x56c   : > { %1289 = vst [vmem:[%s2286_s22 + $0x58] sm:$0xff] %v1285_v43 }
 0x56d   : > { %1761 = shalt.err (!%p1758_p0)
}
 0x56e   : > { %s1811_s13 = smov 256   ;;  %s1812_s27 = smov 16  }
 0x56f   : > { %1523 = dma.vmem_to_hbm [thread:$0]  (%p1919_p11), %s1304_s21, 1536, %s1306_s30, %s1291_s24, %s1811_s13, %s1811_s13, %s1812_s27  }
 0x570 PF: > { %s2402_s29 = sld [smem:[#allocation12_spill]]  ;;  %p1536_p8 = pnand %p1436_p9, %p1923_p12 }
 0x572   : > { %p1537_p10 = pneg %p1536_p8 }
 0x576   : > { %s1320_s11 = sand.u32 1, %s2402_s29  }
 0x577   : > { %s1321_s19 = scalar_lea.sflag [#allocation4], %s1320_s11 }
 0x578   : > { %1787 = dma.done.wait (%p1537_p10), %s1321_s19, 1536  }
 0x579   : > { %1789 = vsyncadd (%p1537_p10), %s1321_s19, 4294965760  ;;  %s2405_s20 = sld [smem:[#allocation15_spill]]  ;;  %s2408_s17 = smov %s1796_s18 }
 0x57a   : > { %s2406_s12 = sld [smem:[#allocation13_spill]] }
 0x57b   : > { %s2407_s19 = sld [smem:[#allocation16_spill]] }
 0x57f   : > { %p27_p1 = scmp.ge.s32.totalorder %s2405_s20, 4  }
 0x580   : > { %s2409_s18 = smov %s2406_s12 }
 0x581   :  { %29 = sbr.rel (!%p27_p1) target bundleno = 12 (0xc), region = 136 }
 0x586   :  { %1327 = vsyncpa [#allocation3], 1 }
 0x587   :  { %1329 = vsyncpa [#allocation3 + $0x1], 1 }
 0x588   :  { %1330 = vsyncpa [#allocation6], 1 }
 0x589   :  { %1332 = vsyncpa [#allocation6 + $0x1], 1 }
 0x58a   :  { %1333 = vsyncpa [#allocation4], 1 }
 0x58b   :  { %1335 = vsyncpa [#allocation4 + $0x1], 1 }

</bundles_post_ra>
